<compile_context>
chip_gen: v5e
topology: v5e:2x2
jax: 0.10.0
libtpu: 0.0.40
codegen_flags: <defaults>
</compile_context>

<pallas_src>
import jax
import jax.numpy as jnp
from jax.experimental import pallas as pl
from jax.experimental.pallas import tpu as pltpu

LRELU_SLOPE = 0.2
BN_EPS = 1e-5
ACT_DTYPE = jnp.bfloat16           # inter-layer activation storage dtype
VMEM_LIMIT = 8 * 1024 * 1024       # largest single call uses ~0.75 MiB


def _lrelu(y):
    return jnp.where(y >= 0, y, LRELU_SLOPE * y)


# ------------------------------ Pallas kernels -------------------------------

def _conv_lrelu_kernel(w_ref, p_ref, o_ref):
    """(Cout,K)f32 @ (K,M)f32 -> f32, fused LeakyReLU, bf16 store.  Lane dim = M."""
    p = p_ref[...].astype(jnp.float32)        # bf16 storage -> f32 MXU operands
    y = jnp.dot(w_ref[...], p, preferred_element_type=jnp.float32)
    o_ref[...] = _lrelu(y).astype(o_ref.dtype)


def _conv_bn_lrelu_kernel(w_ref, p_ref, g_ref, b_ref, o_ref):
    """Conv matmul + training-mode BatchNorm (batch stats) + LeakyReLU, fused.

    Layout is (Cout, M): per-channel statistics are lane-dim reductions, so the
    conv output is produced, reduced and normalized without leaving VMEM.
    NOTE: statistics are taken over the full M in a single block; do NOT tile M
    without accumulating partial sums across blocks.
    """
    p = p_ref[...].astype(jnp.float32)
    y = jnp.dot(w_ref[...], p, preferred_element_type=jnp.float32)    # (C, M)
    inv_m = 1.0 / y.shape[1]
    mean = jnp.sum(y, axis=1, keepdims=True) * inv_m                  # (C, 1)
    d = y - mean
    var = jnp.sum(d * d, axis=1, keepdims=True) * inv_m               # biased var
    scale = g_ref[...] * jax.lax.rsqrt(var + BN_EPS)                  # (C, 1)
    o_ref[...] = _lrelu(d * scale + b_ref[...]).astype(o_ref.dtype)


def _conv4_bn_lrelu_conv5_sigmoid_kernel(p_ref, w4_ref, g_ref, b_ref, w5_ref, o_ref):
    """Layer 4 (conv + BN + LeakyReLU) with layer 5 (4x4 'valid' conv + sigmoid)
    folded into the epilogue.  The (M4, C4) activation never leaves VMEM.
    The per-sample segment sum is built from an in-kernel iota selector, so no
    replicated-w5 / eye-selector arrays are DMA'd from HBM.
    """
    p = p_ref[...].astype(jnp.float32)                                 # (M4, K4)
    y = jnp.dot(p, w4_ref[...], preferred_element_type=jnp.float32)   # (M4, C4)
    inv_m = 1.0 / y.shape[0]
    mean = jnp.sum(y, axis=0, keepdims=True) * inv_m                   # (1, C4)
    d = y - mean
    var = jnp.sum(d * d, axis=0, keepdims=True) * inv_m
    scale = g_ref[...] * jax.lax.rsqrt(var + BN_EPS)
    act4 = _lrelu(d * scale + b_ref[...])                              # (M4, C4)

    m4 = act4.shape[0]
    n = m4 // 16                     # rows are (sample, 4x4 position)-major
    # layer 5: the 4x4 valid conv covers the whole 4x4 map == per-sample full
    # contraction of act4 with the spatially unrolled w5 (16, C4).
    w5_full = jnp.concatenate([w5_ref[...]] * n, axis=0)               # (M4, C4)
    s = jnp.sum(act4 * w5_full, axis=1, keepdims=True)                 # (M4, 1)
    kk = jax.lax.broadcasted_iota(jnp.int32, (n, m4), 0)               # sample id
    mm = jax.lax.broadcasted_iota(jnp.int32, (n, m4), 1)               # row id
    sel = ((mm >= kk * 16) & (mm < (kk + 1) * 16)).astype(jnp.float32)
    logits = jnp.dot(sel, s, preferred_element_type=jnp.float32)       # (N, 1)
    # numerically stable, exact sigmoid (matches the f32 reference)
    z = jnp.exp(-jnp.abs(logits))
    num = jnp.where(logits >= 0, 1.0, z)
    o_ref[...] = num / (1.0 + z)


# ----------------------------- pallas_call wrappers ---------------------------
# Single-block, grid-less calls: whole operands live in VMEM for one invocation
# (largest call: ~192 KiB bf16 patches + ~384 KiB f32 upcast + 64 KiB output).

def conv_lrelu(w_ck, patches_km):
    C, _ = w_ck.shape
    _, M = patches_km.shape
    return pl.pallas_call(
        _conv_lrelu_kernel,
        out_shape=jax.ShapeDtypeStruct((C, M), ACT_DTYPE),
        compiler_params=pltpu.CompilerParams(vmem_limit_bytes=VMEM_LIMIT),
    )(w_ck, patches_km)


def conv_bn_lrelu(w_ck, patches_km, gamma_c1, beta_c1):
    C, _ = w_ck.shape
    _, M = patches_km.shape
    return pl.pallas_call(
        _conv_bn_lrelu_kernel,
        out_shape=jax.ShapeDtypeStruct((C, M), ACT_DTYPE),
        compiler_params=pltpu.CompilerParams(vmem_limit_bytes=VMEM_LIMIT),
    )(w_ck, patches_km, gamma_c1, beta_c1)


def conv4_bn_lrelu_conv5_sigmoid(patches_mk, w4_kc, gamma_1c, beta_1c, w5_pc):
    M4, _ = patches_mk.shape
    N = M4 // 16
    return pl.pallas_call(
        _conv4_bn_lrelu_conv5_sigmoid_kernel,
        out_shape=jax.ShapeDtypeStruct((N, 1), jnp.float32),
        compiler_params=pltpu.CompilerParams(vmem_limit_bytes=VMEM_LIMIT),
    )(patches_mk, w4_kc, gamma_1c, beta_1c, w5_pc)


# --------------------------------- JAX glue -----------------------------------

def im2col_T(x_nhwc, kh, kw, stride, pad):
    """Patches (kh*kw*Cin, N*Ho*Wo); K ordered (i, j, ci), M ordered (n, ho, wo)."""
    if pad:
        x_nhwc = jnp.pad(x_nhwc, ((0, 0), (pad, pad), (pad, pad), (0, 0)))
    N, H, W, C = x_nhwc.shape
    Ho = (H - kh) // stride + 1
    Wo = (W - kw) // stride + 1
    taps = []
    for i in range(kh):
        for j in range(kw):
            taps.append(jax.lax.slice(
                x_nhwc, (0, i, j, 0),
                (N, i + (Ho - 1) * stride + 1, j + (Wo - 1) * stride + 1, C),
                (1, stride, stride, 1)))                 # (N, Ho, Wo, C)
    p = jnp.stack(taps, axis=0)                          # (kh*kw, N, Ho, Wo, C)
    p = jnp.transpose(p, (0, 4, 1, 2, 3))                # (kh*kw, C, N, Ho, Wo)
    return p.reshape(kh * kw * C, N * Ho * Wo), (N, Ho, Wo)


def cm_to_nhwc(y_cm, N, Ho, Wo):
    C = y_cm.shape[0]
    return jnp.transpose(y_cm.reshape(C, N, Ho, Wo), (1, 2, 3, 0))


def prepare_params(params):
    """One-time conversion of PyTorch-layout params to kernel layouts
    (hoisted out of the jitted forward)."""
    def w_ck(w):   # OIHW -> (Cout, K) with K ordered (kh, kw, Cin), f32
        Cout, Cin, kh, kw = w.shape
        return jnp.transpose(w, (2, 3, 1, 0)).reshape(kh * kw * Cin, Cout).T

    w4 = params["w4"]
    C4o, C4i, kh, kw = w4.shape
    w4_kc = jnp.transpose(w4, (2, 3, 1, 0)).reshape(kh * kw * C4i, C4o)  # (K4, C4)

    w5 = params["w5"]                                     # (1, C4, 4, 4)
    w5_pc = w5.reshape(w5.shape[1], 16).T                 # (16, C4), p = h*4 + w

    return {
        "w1": w_ck(params["w1"]),
        "w2": w_ck(params["w2"]),
        "w3": w_ck(params["w3"]),
        "w4": w4_kc,
        "w5": w5_pc,
        "g2": params["gamma2"].reshape(-1, 1), "b2": params["beta2"].reshape(-1, 1),
        "g3": params["gamma3"].reshape(-1, 1), "b3": params["beta3"].reshape(-1, 1),
        "g4": params["gamma4"].reshape(1, -1), "b4": params["beta4"].reshape(1, -1),
    }


def discriminator_forward(prep, x_nhwc):
    """x_nhwc: (N, 64, 64, 3) bf16 (NCHW->NHWC + cast hoisted out of jit)."""
    # layer 1: conv(s2, p1) + LeakyReLU (fused)
    p1, (N, H1, W1) = im2col_T(x_nhwc, 4, 4, 2, 1)
    y1 = conv_lrelu(prep["w1"], p1)                       # (ndf, N*32*32) bf16

    # layers 2-3: conv + BatchNorm(batch stats) + LeakyReLU, fused per layer
    x1 = cm_to_nhwc(y1, N, H1, W1)
    p2, (N, H2, W2) = im2col_T(x1, 4, 4, 2, 1)
    y2 = conv_bn_lrelu(prep["w2"], p2, prep["g2"], prep["b2"])

    x2 = cm_to_nhwc(y2, N, H2, W2)
    p3, (N, H3, W3) = im2col_T(x2, 4, 4, 2, 1)
    y3 = conv_bn_lrelu(prep["w3"], p3, prep["g3"], prep["b3"])

    # layer 4 (conv + BN + LeakyReLU) with layer 5 (4x4 valid conv + sigmoid) fused
    x3 = cm_to_nhwc(y3, N, H3, W3)
    p4_t, (N, H4, W4) = im2col_T(x3, 4, 4, 2, 1)
    assert (H4, W4) == (4, 4), (H4, W4)    # layer-5 fold assumes a 4x4 final map
    p4 = p4_t.T                                           # (N*16, K4), rows (n, ho, wo)
    out = conv4_bn_lrelu_conv5_sigmoid(p4, prep["w4"], prep["g4"], prep["b4"],
                                       prep["w5"])        # (N, 1)
    return out.reshape(-1)                 # == output.view(-1, 1).squeeze(1)


# ----------------------------- pure-JAX reference ------------------------------

def reference_forward(params, x_nchw):
    x = x_nchw.astype(jnp.float32)

    def conv(x, w, stride, pad):
        return jax.lax.conv_general_dilated(
            x, w, (stride, stride), ((pad, pad), (pad, pad)),
            dimension_numbers=("NCHW", "OIHW", "NCHW"))

    def lrelu(v):
        return jnp.where(v >= 0, v, LRELU_SLOPE * v)

    x = lrelu(conv(x, params["w1"], 2, 1))
    for idx in (2, 3, 4):
        x = conv(x, params[f"w{idx}"], 2, 1)
        mean = jnp.mean(x, axis=(0, 2, 3), keepdims=True)
        var = jnp.var(x, axis=(0, 2, 3), keepdims=True)
        g = params[f"gamma{idx}"].reshape(1, -1, 1, 1)
        b = params[f"beta{idx}"].reshape(1, -1, 1, 1)
        x = lrelu((x - mean) / jnp.sqrt(var + BN_EPS) * g + b)
    x = 1.0 / (1.0 + jnp.exp(-conv(x, params["w5"], 1, 0)))
    return x.reshape(-1)


# ------------------------------------ main -------------------------------------

if __name__ == "__main__":
    key = jax.random.PRNGKey(0)
    ndf, nc, N, S = 8, 3, 2, 64                # 64x64 input -> 1x1 output (DCGAN D)
    keys = jax.random.split(key, 10)

    def winit(k, shape):
        return (0.02 * jax.random.normal(k, shape)).astype(jnp.float32)

    params = {
        "w1": winit(keys[0], (ndf, nc, 4, 4)),
        "w2": winit(keys[1], (ndf * 2, ndf, 4, 4)),
        "w3": winit(keys[2], (ndf * 4, ndf * 2, 4, 4)),
        "w4": winit(keys[3], (ndf * 8, ndf * 4, 4, 4)),
        "w5": winit(keys[4], (1, ndf * 8, 4, 4)),
        "gamma2": (1.0 + 0.02 * jax.random.normal(keys[5], (ndf * 2,))).astype(jnp.float32),
        "beta2": jnp.zeros((ndf * 2,), jnp.float32),
        "gamma3": (1.0 + 0.02 * jax.random.normal(keys[6], (ndf * 4,))).astype(jnp.float32),
        "beta3": jnp.zeros((ndf * 4,), jnp.float32),
        "gamma4": (1.0 + 0.02 * jax.random.normal(keys[7], (ndf * 8,))).astype(jnp.float32),
        "beta4": jnp.zeros((ndf * 8,), jnp.float32),
    }

    x = jax.random.normal(keys[8], (N, nc, S, S), dtype=jnp.float32)

    prep = prepare_params(params)                          # hoisted weight layouts
    # NCHW -> NHWC + bf16 cast hoisted out of the jitted hot path
    x_nhwc = jnp.transpose(x, (0, 2, 3, 1)).astype(ACT_DTYPE)

    fwd = jax.jit(discriminator_forward)
    out = jax.block_until_ready(fwd(prep, x_nhwc))
    ref = jax.block_until_ready(reference_forward(params, x))

    assert out.shape == (N,), out.shape
    # bf16 inter-layer activation storage vs. the all-f32 reference
    assert jnp.allclose(out, ref, atol=1e-2, rtol=1e-2), (out, ref)
    print("KERNEL_OK")
</pallas_src>

<mosaic_0001>
module attributes {stable_mosaic.version = 11 : i64} {
  func.func @_conv_lrelu_kernel(%arg0: memref<8x48xf32, #tpu.memory_space<vmem>>, %arg1: memref<48x2048xbf16, #tpu.memory_space<vmem>>, %arg2: memref<8x2048xbf16, #tpu.memory_space<vmem>>) attributes {dimension_semantics = [], scalar_prefetch = 0 : i64, scratch_operands = 0 : i64, tpu.core_type = #tpu.core_type<tc>} {
    %c0 = arith.constant 0 : index
    %c0_0 = arith.constant 0 : index
    %0 = vector.load %arg1[%c0, %c0_0] : memref<48x2048xbf16, #tpu.memory_space<vmem>>, vector<48x2048xbf16>
    %1 = arith.extf %0 : vector<48x2048xbf16> to vector<48x2048xf32>
    %c0_1 = arith.constant 0 : index
    %c0_2 = arith.constant 0 : index
    %2 = vector.load %arg0[%c0_1, %c0_2] : memref<8x48xf32, #tpu.memory_space<vmem>>, vector<8x48xf32>
    %cst = arith.constant dense<0.000000e+00> : vector<8x2048xf32>
    %3 = tpu.matmul %2, %1, %cst {dimension_numbers = #tpu.dot_dimension_numbers<[1], [0], [0], [1], [0, 0, 1, 1], [], []>} : vector<8x48xf32>, vector<48x2048xf32>, vector<8x2048xf32> -> vector<8x2048xf32>
    %cst_3 = arith.constant 0.000000e+00 : f32
    %4 = vector.broadcast %cst_3 : f32 to vector<8x2048xf32>
    %5 = arith.cmpf oge, %3, %4 : vector<8x2048xf32>
    %cst_4 = arith.constant 2.000000e-01 : f32
    %6 = vector.broadcast %cst_4 : f32 to vector<8x2048xf32>
    %7 = arith.mulf %6, %3 : vector<8x2048xf32>
    %8 = arith.select %5, %3, %7 : vector<8x2048xi1>, vector<8x2048xf32>
    %9 = arith.truncf %8 : vector<8x2048xf32> to vector<8x2048xbf16>
    %c0_5 = arith.constant 0 : index
    %c0_6 = arith.constant 0 : index
    %10 = vector.load %arg2[%c0_5, %c0_6] : memref<8x2048xbf16, #tpu.memory_space<vmem>>, vector<8x2048xbf16>
    tpu.vector_store %arg2[%c0_5, %c0_6], %9 {strides = array<i32>} : memref<8x2048xbf16, #tpu.memory_space<vmem>>, vector<8x2048xbf16>,
    return
  }
}

module attributes {stable_mosaic.version = 11 : i64} {
  func.func @_conv_bn_lrelu_kernel(%arg0: memref<16x128xf32, #tpu.memory_space<vmem>>, %arg1: memref<128x512xbf16, #tpu.memory_space<vmem>>, %arg2: memref<16x1xf32, #tpu.memory_space<vmem>>, %arg3: memref<16x1xf32, #tpu.memory_space<vmem>>, %arg4: memref<16x512xbf16, #tpu.memory_space<vmem>>) attributes {dimension_semantics = [], scalar_prefetch = 0 : i64, scratch_operands = 0 : i64, tpu.core_type = #tpu.core_type<tc>} {
    %c0 = arith.constant 0 : index
    %c0_0 = arith.constant 0 : index
    %0 = vector.load %arg1[%c0, %c0_0] : memref<128x512xbf16, #tpu.memory_space<vmem>>, vector<128x512xbf16>
    %1 = arith.extf %0 : vector<128x512xbf16> to vector<128x512xf32>
    %c0_1 = arith.constant 0 : index
    %c0_2 = arith.constant 0 : index
    %2 = vector.load %arg0[%c0_1, %c0_2] : memref<16x128xf32, #tpu.memory_space<vmem>>, vector<16x128xf32>
    %cst = arith.constant dense<0.000000e+00> : vector<16x512xf32>
    %3 = tpu.matmul %2, %1, %cst {dimension_numbers = #tpu.dot_dimension_numbers<[1], [0], [0], [1], [0, 0, 1, 1], [], []>} : vector<16x128xf32>, vector<128x512xf32>, vector<16x512xf32> -> vector<16x512xf32>
    %cst_3 = arith.constant dense<0.000000e+00> : vector<16xf32>
    %4 = vector.multi_reduction <add>, %3, %cst_3 [1] : vector<16x512xf32> to vector<16xf32>
    %5 = vector.shape_cast %4 : vector<16xf32> to vector<16x1xf32>
    %cst_4 = arith.constant 0.001953125 : f32
    %6 = vector.broadcast %cst_4 : f32 to vector<16x1xf32>
    %7 = arith.mulf %5, %6 : vector<16x1xf32>
    %8 = vector.broadcast %7 : vector<16x1xf32> to vector<16x512xf32>
    %9 = arith.subf %3, %8 : vector<16x512xf32>
    %10 = arith.mulf %9, %9 : vector<16x512xf32>
    %cst_5 = arith.constant dense<0.000000e+00> : vector<16xf32>
    %11 = vector.multi_reduction <add>, %10, %cst_5 [1] : vector<16x512xf32> to vector<16xf32>
    %12 = vector.shape_cast %11 : vector<16xf32> to vector<16x1xf32>
    %cst_6 = arith.constant 0.001953125 : f32
    %13 = vector.broadcast %cst_6 : f32 to vector<16x1xf32>
    %14 = arith.mulf %12, %13 : vector<16x1xf32>
    %c0_7 = arith.constant 0 : index
    %c0_8 = arith.constant 0 : index
    %15 = vector.load %arg2[%c0_7, %c0_8] : memref<16x1xf32, #tpu.memory_space<vmem>>, vector<16x1xf32>
    %cst_9 = arith.constant 9.99999974E-6 : f32
    %16 = vector.broadcast %cst_9 : f32 to vector<16x1xf32>
    %17 = arith.addf %14, %16 : vector<16x1xf32>
    %18 = math.rsqrt %17 : vector<16x1xf32>
    %19 = arith.mulf %15, %18 : vector<16x1xf32>
    %20 = vector.broadcast %19 : vector<16x1xf32> to vector<16x512xf32>
    %21 = arith.mulf %9, %20 : vector<16x512xf32>
    %c0_10 = arith.constant 0 : index
    %c0_11 = arith.constant 0 : index
    %22 = vector.load %arg3[%c0_10, %c0_11] : memref<16x1xf32, #tpu.memory_space<vmem>>, vector<16x1xf32>
    %23 = vector.broadcast %22 : vector<16x1xf32> to vector<16x512xf32>
    %24 = arith.addf %21, %23 : vector<16x512xf32>
    %cst_12 = arith.constant 0.000000e+00 : f32
    %25 = vector.broadcast %cst_12 : f32 to vector<16x512xf32>
    %26 = arith.cmpf oge, %24, %25 : vector<16x512xf32>
    %cst_13 = arith.constant 2.000000e-01 : f32
    %27 = vector.broadcast %cst_13 : f32 to vector<16x512xf32>
    %28 = arith.mulf %27, %24 : vector<16x512xf32>
    %29 = arith.select %26, %24, %28 : vector<16x512xi1>, vector<16x512xf32>
    %30 = arith.truncf %29 : vector<16x512xf32> to vector<16x512xbf16>
    %c0_14 = arith.constant 0 : index
    %c0_15 = arith.constant 0 : index
    %31 = vector.load %arg4[%c0_14, %c0_15] : memref<16x512xbf16, #tpu.memory_space<vmem>>, vector<16x512xbf16>
    tpu.vector_store %arg4[%c0_14, %c0_15], %30 {strides = array<i32>} : memref<16x512xbf16, #tpu.memory_space<vmem>>, vector<16x512xbf16>,
    return
  }
}

module attributes {stable_mosaic.version = 11 : i64} {
  func.func @_conv_bn_lrelu_kernel(%arg0: memref<32x256xf32, #tpu.memory_space<vmem>>, %arg1: memref<256x128xbf16, #tpu.memory_space<vmem>>, %arg2: memref<32x1xf32, #tpu.memory_space<vmem>>, %arg3: memref<32x1xf32, #tpu.memory_space<vmem>>, %arg4: memref<32x128xbf16, #tpu.memory_space<vmem>>) attributes {dimension_semantics = [], scalar_prefetch = 0 : i64, scratch_operands = 0 : i64, tpu.core_type = #tpu.core_type<tc>} {
    %c0 = arith.constant 0 : index
    %c0_0 = arith.constant 0 : index
    %0 = vector.load %arg1[%c0, %c0_0] : memref<256x128xbf16, #tpu.memory_space<vmem>>, vector<256x128xbf16>
    %1 = arith.extf %0 : vector<256x128xbf16> to vector<256x128xf32>
    %c0_1 = arith.constant 0 : index
    %c0_2 = arith.constant 0 : index
    %2 = vector.load %arg0[%c0_1, %c0_2] : memref<32x256xf32, #tpu.memory_space<vmem>>, vector<32x256xf32>
    %cst = arith.constant dense<0.000000e+00> : vector<32x128xf32>
    %3 = tpu.matmul %2, %1, %cst {dimension_numbers = #tpu.dot_dimension_numbers<[1], [0], [0], [1], [0, 0, 1, 1], [], []>} : vector<32x256xf32>, vector<256x128xf32>, vector<32x128xf32> -> vector<32x128xf32>
    %cst_3 = arith.constant dense<0.000000e+00> : vector<32xf32>
    %4 = vector.multi_reduction <add>, %3, %cst_3 [1] : vector<32x128xf32> to vector<32xf32>
    %5 = vector.shape_cast %4 : vector<32xf32> to vector<32x1xf32>
    %cst_4 = arith.constant 7.812500e-03 : f32
    %6 = vector.broadcast %cst_4 : f32 to vector<32x1xf32>
    %7 = arith.mulf %5, %6 : vector<32x1xf32>
    %8 = vector.broadcast %7 : vector<32x1xf32> to vector<32x128xf32>
    %9 = arith.subf %3, %8 : vector<32x128xf32>
    %10 = arith.mulf %9, %9 : vector<32x128xf32>
    %cst_5 = arith.constant dense<0.000000e+00> : vector<32xf32>
    %11 = vector.multi_reduction <add>, %10, %cst_5 [1] : vector<32x128xf32> to vector<32xf32>
    %12 = vector.shape_cast %11 : vector<32xf32> to vector<32x1xf32>
    %cst_6 = arith.constant 7.812500e-03 : f32
    %13 = vector.broadcast %cst_6 : f32 to vector<32x1xf32>
    %14 = arith.mulf %12, %13 : vector<32x1xf32>
    %c0_7 = arith.constant 0 : index
    %c0_8 = arith.constant 0 : index
    %15 = vector.load %arg2[%c0_7, %c0_8] : memref<32x1xf32, #tpu.memory_space<vmem>>, vector<32x1xf32>
    %cst_9 = arith.constant 9.99999974E-6 : f32
    %16 = vector.broadcast %cst_9 : f32 to vector<32x1xf32>
    %17 = arith.addf %14, %16 : vector<32x1xf32>
    %18 = math.rsqrt %17 : vector<32x1xf32>
    %19 = arith.mulf %15, %18 : vector<32x1xf32>
    %20 = vector.broadcast %19 : vector<32x1xf32> to vector<32x128xf32>
    %21 = arith.mulf %9, %20 : vector<32x128xf32>
    %c0_10 = arith.constant 0 : index
    %c0_11 = arith.constant 0 : index
    %22 = vector.load %arg3[%c0_10, %c0_11] : memref<32x1xf32, #tpu.memory_space<vmem>>, vector<32x1xf32>
    %23 = vector.broadcast %22 : vector<32x1xf32> to vector<32x128xf32>
    %24 = arith.addf %21, %23 : vector<32x128xf32>
    %cst_12 = arith.constant 0.000000e+00 : f32
    %25 = vector.broadcast %cst_12 : f32 to vector<32x128xf32>
    %26 = arith.cmpf oge, %24, %25 : vector<32x128xf32>
    %cst_13 = arith.constant 2.000000e-01 : f32
    %27 = vector.broadcast %cst_13 : f32 to vector<32x128xf32>
    %28 = arith.mulf %27, %24 : vector<32x128xf32>
    %29 = arith.select %26, %24, %28 : vector<32x128xi1>, vector<32x128xf32>
    %30 = arith.truncf %29 : vector<32x128xf32> to vector<32x128xbf16>
    %c0_14 = arith.constant 0 : index
    %c0_15 = arith.constant 0 : index
    %31 = vector.load %arg4[%c0_14, %c0_15] : memref<32x128xbf16, #tpu.memory_space<vmem>>, vector<32x128xbf16>
    tpu.vector_store %arg4[%c0_14, %c0_15], %30 {strides = array<i32>} : memref<32x128xbf16, #tpu.memory_space<vmem>>, vector<32x128xbf16>,
    return
  }
}

module attributes {stable_mosaic.version = 11 : i64} {
  func.func @_conv4_bn_lrelu_conv5_sigmoid_kernel(%arg0: memref<32x512xbf16, #tpu.memory_space<vmem>>, %arg1: memref<512x64xf32, #tpu.memory_space<vmem>>, %arg2: memref<1x64xf32, #tpu.memory_space<vmem>>, %arg3: memref<1x64xf32, #tpu.memory_space<vmem>>, %arg4: memref<16x64xf32, #tpu.memory_space<vmem>>, %arg5: memref<2x1xf32, #tpu.memory_space<vmem>>) attributes {dimension_semantics = [], scalar_prefetch = 0 : i64, scratch_operands = 0 : i64, tpu.core_type = #tpu.core_type<tc>} {
    %c0 = arith.constant 0 : index
    %c0_0 = arith.constant 0 : index
    %0 = vector.load %arg0[%c0, %c0_0] : memref<32x512xbf16, #tpu.memory_space<vmem>>, vector<32x512xbf16>
    %1 = arith.extf %0 : vector<32x512xbf16> to vector<32x512xf32>
    %c0_1 = arith.constant 0 : index
    %c0_2 = arith.constant 0 : index
    %2 = vector.load %arg1[%c0_1, %c0_2] : memref<512x64xf32, #tpu.memory_space<vmem>>, vector<512x64xf32>
    %cst = arith.constant dense<0.000000e+00> : vector<32x64xf32>
    %3 = tpu.matmul %1, %2, %cst {dimension_numbers = #tpu.dot_dimension_numbers<[1], [0], [0], [1], [0, 0, 1, 1], [], []>} : vector<32x512xf32>, vector<512x64xf32>, vector<32x64xf32> -> vector<32x64xf32>
    %cst_3 = arith.constant dense<0.000000e+00> : vector<64xf32>
    %4 = vector.multi_reduction <add>, %3, %cst_3 [0] : vector<32x64xf32> to vector<64xf32>
    %5 = vector.shape_cast %4 : vector<64xf32> to vector<1x64xf32>
    %cst_4 = arith.constant 3.125000e-02 : f32
    %6 = vector.broadcast %cst_4 : f32 to vector<1x64xf32>
    %7 = arith.mulf %5, %6 : vector<1x64xf32>
    %8 = vector.broadcast %7 : vector<1x64xf32> to vector<32x64xf32>
    %9 = arith.subf %3, %8 : vector<32x64xf32>
    %10 = arith.mulf %9, %9 : vector<32x64xf32>
    %cst_5 = arith.constant dense<0.000000e+00> : vector<64xf32>
    %11 = vector.multi_reduction <add>, %10, %cst_5 [0] : vector<32x64xf32> to vector<64xf32>
    %12 = vector.shape_cast %11 : vector<64xf32> to vector<1x64xf32>
    %cst_6 = arith.constant 3.125000e-02 : f32
    %13 = vector.broadcast %cst_6 : f32 to vector<1x64xf32>
    %14 = arith.mulf %12, %13 : vector<1x64xf32>
    %c0_7 = arith.constant 0 : index
    %c0_8 = arith.constant 0 : index
    %15 = vector.load %arg2[%c0_7, %c0_8] : memref<1x64xf32, #tpu.memory_space<vmem>>, vector<1x64xf32>
    %cst_9 = arith.constant 9.99999974E-6 : f32
    %16 = vector.broadcast %cst_9 : f32 to vector<1x64xf32>
    %17 = arith.addf %14, %16 : vector<1x64xf32>
    %18 = math.rsqrt %17 : vector<1x64xf32>
    %19 = arith.mulf %15, %18 : vector<1x64xf32>
    %20 = vector.broadcast %19 : vector<1x64xf32> to vector<32x64xf32>
    %21 = arith.mulf %9, %20 : vector<32x64xf32>
    %c0_10 = arith.constant 0 : index
    %c0_11 = arith.constant 0 : index
    %22 = vector.load %arg3[%c0_10, %c0_11] : memref<1x64xf32, #tpu.memory_space<vmem>>, vector<1x64xf32>
    %23 = vector.broadcast %22 : vector<1x64xf32> to vector<32x64xf32>
    %24 = arith.addf %21, %23 : vector<32x64xf32>
    %cst_12 = arith.constant 0.000000e+00 : f32
    %25 = vector.broadcast %cst_12 : f32 to vector<32x64xf32>
    %26 = arith.cmpf oge, %24, %25 : vector<32x64xf32>
    %cst_13 = arith.constant 2.000000e-01 : f32
    %27 = vector.broadcast %cst_13 : f32 to vector<32x64xf32>
    %28 = arith.mulf %27, %24 : vector<32x64xf32>
    %29 = arith.select %26, %24, %28 : vector<32x64xi1>, vector<32x64xf32>
    %c0_14 = arith.constant 0 : index
    %c0_15 = arith.constant 0 : index
    %30 = vector.load %arg4[%c0_14, %c0_15] : memref<16x64xf32, #tpu.memory_space<vmem>>, vector<16x64xf32>
    %31 = tpu.concatenate %30, %30 in 0 : vector<16x64xf32>, vector<16x64xf32> -> vector<32x64xf32>
    %32 = arith.mulf %29, %31 : vector<32x64xf32>
    %cst_16 = arith.constant dense<0.000000e+00> : vector<32xf32>
    %33 = vector.multi_reduction <add>, %32, %cst_16 [1] : vector<32x64xf32> to vector<32xf32>
    %34 = vector.shape_cast %33 : vector<32xf32> to vector<32x1xf32>
    %35 = tpu.iota {dimensions = array<i32: 0>} : vector<2x32xi32>
    %36 = tpu.iota {dimensions = array<i32: 1>} : vector<2x32xi32>
    %c16_i32 = arith.constant 16 : i32
    %37 = vector.broadcast %c16_i32 : i32 to vector<2x32xi32>
    %38 = arith.muli %35, %37 : vector<2x32xi32>
    %39 = arith.cmpi sge, %36, %38 : vector<2x32xi32>
    %c1_i32 = arith.constant 1 : i32
    %40 = vector.broadcast %c1_i32 : i32 to vector<2x32xi32>
    %41 = arith.addi %35, %40 : vector<2x32xi32>
    %c16_i32_17 = arith.constant 16 : i32
    %42 = vector.broadcast %c16_i32_17 : i32 to vector<2x32xi32>
    %43 = arith.muli %41, %42 : vector<2x32xi32>
    %44 = arith.cmpi slt, %36, %43 : vector<2x32xi32>
    %45 = arith.andi %39, %44 : vector<2x32xi1>
    %46 = arith.extui %45 : vector<2x32xi1> to vector<2x32xi32>
    %47 = arith.sitofp %46 : vector<2x32xi32> to vector<2x32xf32>
    %cst_18 = arith.constant dense<0.000000e+00> : vector<2x1xf32>
    %48 = tpu.matmul %47, %34, %cst_18 {dimension_numbers = #tpu.dot_dimension_numbers<[1], [0], [0], [1], [0, 0, 1, 1], [], []>} : vector<2x32xf32>, vector<32x1xf32>, vector<2x1xf32> -> vector<2x1xf32>
    %49 = math.absf %48 : vector<2x1xf32>
    %cst_19 = arith.constant 0.000000e+00 : f32
    %50 = vector.broadcast %cst_19 : f32 to vector<2x1xf32>
    %51 = arith.subf %50, %49 : vector<2x1xf32>
    %52 = math.exp %51 : vector<2x1xf32>
    %cst_20 = arith.constant 0.000000e+00 : f32
    %53 = vector.broadcast %cst_20 : f32 to vector<2x1xf32>
    %54 = arith.cmpf oge, %48, %53 : vector<2x1xf32>
    %cst_21 = arith.constant 1.000000e+00 : f32
    %55 = vector.broadcast %cst_21 : f32 to vector<2x1xf32>
    %56 = arith.select %54, %55, %52 : vector<2x1xi1>, vector<2x1xf32>
    %cst_22 = arith.constant 1.000000e+00 : f32
    %57 = vector.broadcast %cst_22 : f32 to vector<2x1xf32>
    %58 = arith.addf %57, %52 : vector<2x1xf32>
    %59 = arith.divf %56, %58 : vector<2x1xf32>
    %c0_23 = arith.constant 0 : index
    %c0_24 = arith.constant 0 : index
    %60 = vector.load %arg5[%c0_23, %c0_24] : memref<2x1xf32, #tpu.memory_space<vmem>>, vector<2x1xf32>
    tpu.vector_store %arg5[%c0_23, %c0_24], %59 {strides = array<i32>} : memref<2x1xf32, #tpu.memory_space<vmem>>, vector<2x1xf32>,
    return
  }
}

</mosaic_0001>

<bundles_post_ra>
// kernel: discriminator_forward.4
= control target key start
LH: loop header
LB: loop body
LE: loop exit
PB: predicated region body
PF: predicated region fallthrough
CT: control target
= control target key end

     0   :  { %vm156_vm0 = vcmask 392192   ;;  %s784_s1 = inlined_call_operand.vmem [shape: bf16[48,2048], index: 1, kind: input, shape index: {}]   ;;  %s785_s0 = inlined_call_operand.vmem [shape: f32[8,48], index: 0, kind: input, shape index: {}]   ;;  %s786_s2 = inlined_call_operand.vmem [shape: bf16[8,2048], index: 2, kind: output, shape index: {}]  }
   0x1   :  { %v52_v0 = vld [vmem:[%s784_s1 + $0x148] sm:$0xff]  ;;  %v51_v2 = vld [vmem:[%s784_s1 + $0x140] sm:$0xff]  ;;  %v54_v29 = vld [vmem:[%s784_s1 + $0x158] sm:$0xff] }
   0x2   :  { %v44_v1 = vld [vmem:[%s784_s1 + $0x108] sm:$0xff]  ;;  %v141_v3 = vunpack.c.l.bf16 %v52_v0  ;;  %v142_v4 = vunpack.c.h.bf16 %v52_v0  ;;  %v43_v8 = vld [vmem:[%s784_s1 + $0x100] sm:$0xff]  ;;  %v139_v9 = vunpack.c.l.bf16 %v51_v2  ;;  %v140_v10 = vunpack.c.h.bf16 %v51_v2  ;;  %v46_v35 = vld [vmem:[%s784_s1 + $0x118] sm:$0xff] }
   0x3   :  { %v125_v5 = vunpack.c.l.bf16 %v44_v1  ;;  %v126_v6 = vunpack.c.h.bf16 %v44_v1  ;;  %v36_v7 = vld [vmem:[%s784_s1 + $0xc8] sm:$0xff]  ;;  %v35_v12 = vld [vmem:[%s784_s1 + $0xc0] sm:$0xff]  ;;  %v123_v15 = vunpack.c.l.bf16 %v43_v8  ;;  %v124_v16 = vunpack.c.h.bf16 %v43_v8  ;;  %v53_v38 = vld [vmem:[%s784_s1 + $0x150] sm:$0xff] }
   0x4   :  { %v28_v11 = vld [vmem:[%s784_s1 + $0x88] sm:$0xff]  ;;  %210 = vmatpush.msra.mxu2 %v141_v3  ;;  %230 = vmatpush.msra.mxu3 %v142_v4  ;;  %v109_v13 = vunpack.c.l.bf16 %v36_v7  ;;  %v110_v14 = vunpack.c.h.bf16 %v36_v7  ;;  %v27_v17 = vld [vmem:[%s784_s1 + $0x80] sm:$0xff]  ;;  %v107_v18 = vunpack.c.l.bf16 %v35_v12  ;;  %v108_v19 = vunpack.c.h.bf16 %v35_v12  ;;  %v38_v41 = vld [vmem:[%s784_s1 + $0xd8] sm:$0xff] }
   0x5   :  { %170 = vmatpush.msra.mxu0 %v139_v9  ;;  %190 = vmatpush.msra.mxu1 %v140_v10  ;;  %v20_v20 = vld [vmem:[%s784_s1 + $0x48] sm:$0xff]  ;;  %v93_v21 = vunpack.c.l.bf16 %v28_v11  ;;  %v94_v22 = vunpack.c.h.bf16 %v28_v11  ;;  %v19_v23 = vld [vmem:[%s784_s1 + $0x40] sm:$0xff]  ;;  %v91_v24 = vunpack.c.l.bf16 %v27_v17  ;;  %v92_v25 = vunpack.c.h.bf16 %v27_v17  ;;  %v45_v44 = vld [vmem:[%s784_s1 + $0x110] sm:$0xff] }
   0x6   :  { %211 = vmatpush.msra.mxu2 %v125_v5  ;;  %231 = vmatpush.msra.mxu3 %v126_v6  ;;  %v12_v26 = vld [vmem:[%s784_s1 + $0x8] sm:$0xff]  ;;  %v77_v27 = vunpack.c.l.bf16 %v20_v20  ;;  %v78_v28 = vunpack.c.h.bf16 %v20_v20  ;;  %v75_v30 = vunpack.c.l.bf16 %v19_v23  ;;  %v76_v31 = vunpack.c.h.bf16 %v19_v23  ;;  %v11_v32 = vld [vmem:[%s784_s1] sm:$0xff]  ;;  %v30_v47 = vld [vmem:[%s784_s1 + $0x98] sm:$0xff] }
   0x7   :  { %171 = vmatpush.msra.mxu0 %v123_v15  ;;  %191 = vmatpush.msra.mxu1 %v124_v16  ;;  %v61_v33 = vunpack.c.l.bf16 %v12_v26  ;;  %v62_v34 = vunpack.c.h.bf16 %v12_v26  ;;  %v145_v36 = vunpack.c.l.bf16 %v54_v29  ;;  %v146_v37 = vunpack.c.h.bf16 %v54_v29  ;;  %v37_v52 = vld [vmem:[%s784_s1 + $0xd0] sm:$0xff]  ;;  %v22_v55 = vld [vmem:[%s784_s1 + $0x58] sm:$0xff]  ;;  %v645_v57 = vld [vmem:[%s785_s0] sm:$0xff] }
   0x8   :  { %212 = vmatpush.msra.mxu2 %v109_v13  ;;  %232 = vmatpush.msra.mxu3 %v110_v14  ;;  %v59_v39 = vunpack.c.l.bf16 %v11_v32  ;;  %v60_v40 = vunpack.c.h.bf16 %v11_v32  ;;  %v129_v42 = vunpack.c.l.bf16 %v46_v35  ;;  %v130_v43 = vunpack.c.h.bf16 %v46_v35  ;;  %v29_v56 = vld [vmem:[%s784_s1 + $0x90] sm:$0xff]  ;;  %v14_v60 = vld [vmem:[%s784_s1 + $0x18] sm:$0xff]  ;;  %v56_v63 = vld [vmem:[%s784_s1 + $0x168] sm:$0xff] }
   0x9   :  { %172 = vmatpush.msra.mxu0 %v107_v18  ;;  %192 = vmatpush.msra.mxu1 %v108_v19  ;;  %v143_v45 = vunpack.c.l.bf16 %v53_v38  ;;  %v144_v46 = vunpack.c.h.bf16 %v53_v38  ;;  %v113_v48 = vunpack.c.l.bf16 %v38_v41  ;;  %v114_v49 = vunpack.c.h.bf16 %v38_v41  ;;  %v21_v2 = vld [vmem:[%s784_s1 + $0x50] sm:$0xff]  ;;  %v48_v7 = vld [vmem:[%s784_s1 + $0x128] sm:$0xff]  ;;  %v55_v13 = vld [vmem:[%s784_s1 + $0x160] sm:$0xff] }
   0xa   :  { %213 = vmatpush.msra.mxu2 %v93_v21  ;;  %233 = vmatpush.msra.mxu3 %v94_v22  ;;  %v127_v50 = vunpack.c.l.bf16 %v45_v44  ;;  %v128_v51 = vunpack.c.h.bf16 %v45_v44  ;;  %v97_v53 = vunpack.c.l.bf16 %v30_v47  ;;  %v98_v54 = vunpack.c.h.bf16 %v30_v47  ;;  %v13_v10 = vld [vmem:[%s784_s1 + $0x10] sm:$0xff]  ;;  %v40_v16 = vld [vmem:[%s784_s1 + $0xe8] sm:$0xff]  ;;  %v47_v17 = vld [vmem:[%s784_s1 + $0x120] sm:$0xff] }
   0xb   :  { %173 = vmatpush.msra.mxu0 %v91_v24  ;;  %193 = vmatpush.msra.mxu1 %v92_v25  ;;  %v111_v58 = vunpack.c.l.bf16 %v37_v52  ;;  %v112_v59 = vunpack.c.h.bf16 %v37_v52  ;;  %v81_v61 = vunpack.c.l.bf16 %v22_v55  ;;  %v82_v62 = vunpack.c.h.bf16 %v22_v55  ;;  %v32_v20 = vld [vmem:[%s784_s1 + $0xa8] sm:$0xff]  ;;  %v39_v23 = vld [vmem:[%s784_s1 + $0xe0] sm:$0xff]  ;;  %v58_v35 = vld [vmem:[%s784_s1 + $0x178] sm:$0xff] }
   0xc   :  { %214 = vmatpush.msra.mxu2 %v77_v27  ;;  %234 = vmatpush.msra.mxu3 %v78_v28  ;;  %v95_v0 = vunpack.c.l.bf16 %v29_v56  ;;  %v96_v1 = vunpack.c.h.bf16 %v29_v56  ;;  %v65_v3 = vunpack.c.l.bf16 %v14_v60  ;;  %v66_v4 = vunpack.c.h.bf16 %v14_v60  ;;  %v24_v26 = vld [vmem:[%s784_s1 + $0x68] sm:$0xff]  ;;  %v23_v38 = vld [vmem:[%s784_s1 + $0x60] sm:$0xff]  ;;  %v57_v47 = vld [vmem:[%s784_s1 + $0x170] sm:$0xff] }
   0xd   :  { %174 = vmatpush.msra.mxu0 %v75_v30  ;;  %194 = vmatpush.msra.mxu1 %v76_v31  ;;  %v149_v5 = vunpack.c.l.bf16 %v56_v63  ;;  %v150_v6 = vunpack.c.h.bf16 %v56_v63  ;;  %v79_v8 = vunpack.c.l.bf16 %v21_v2  ;;  %v80_v9 = vunpack.c.h.bf16 %v21_v2  ;;  %v31_v31 = vld [vmem:[%s784_s1 + $0xa0] sm:$0xff]  ;;  %v34_v56 = vld [vmem:[%s784_s1 + $0xb8] sm:$0xff]  ;;  %v33_v2 = vld [vmem:[%s784_s1 + $0xb0] sm:$0xff] }
   0xe   :  { %215 = vmatpush.msra.mxu2 %v61_v33  ;;  %235 = vmatpush.msra.mxu3 %v62_v34  ;;  %v133_v11 = vunpack.c.l.bf16 %v48_v7  ;;  %v134_v12 = vunpack.c.h.bf16 %v48_v7  ;;  %v63_v14 = vunpack.c.l.bf16 %v13_v10  ;;  %v64_v15 = vunpack.c.h.bf16 %v13_v10  ;;  %v16_v34 = vld [vmem:[%s784_s1 + $0x28] sm:$0xff]  ;;  %v25_v10 = vld [vmem:[%s784_s1 + $0x70] sm:$0xff] }
   0xf   :  { %175 = vmatpush.msra.mxu0 %v59_v39  ;;  %195 = vmatpush.msra.mxu1 %v60_v40  ;;  %v147_v18 = vunpack.c.l.bf16 %v55_v13  ;;  %v148_v19 = vunpack.c.h.bf16 %v55_v13  ;;  %v117_v21 = vunpack.c.l.bf16 %v40_v16  ;;  %v118_v22 = vunpack.c.h.bf16 %v40_v16  ;;  %v17_v13 = vld [vmem:[%s784_s1 + $0x30] sm:$0xff] }
  0x10   :  { %290 = vmatpush.msrb.mxu2 %v145_v36  ;;  %310 = vmatpush.msrb.mxu3 %v146_v37  ;;  %v131_v24 = vunpack.c.l.bf16 %v47_v17  ;;  %v132_v25 = vunpack.c.h.bf16 %v47_v17  ;;  %v101_v27 = vunpack.c.l.bf16 %v32_v20  ;;  %v102_v28 = vunpack.c.h.bf16 %v32_v20 }
  0x11   :  { %250 = vmatpush.msrb.mxu0 %v143_v45  ;;  %270 = vmatpush.msrb.mxu1 %v144_v46  ;;  %v115_v29 = vunpack.c.l.bf16 %v39_v23  ;;  %v116_v30 = vunpack.c.h.bf16 %v39_v23  ;;  %v85_v32 = vunpack.c.l.bf16 %v24_v26  ;;  %v86_v33 = vunpack.c.h.bf16 %v24_v26  ;;  %v15_v46 = vld [vmem:[%s784_s1 + $0x20] sm:$0xff] }
  0x12   :  { %291 = vmatpush.msrb.mxu2 %v129_v42  ;;  %311 = vmatpush.msrb.mxu3 %v130_v43  ;;  %v99_v36 = vunpack.c.l.bf16 %v31_v31  ;;  %v100_v37 = vunpack.c.h.bf16 %v31_v31  ;;  %v69_v39 = vunpack.c.l.bf16 %v16_v34  ;;  %v70_v40 = vunpack.c.h.bf16 %v16_v34  ;;  %v50_v43 = vld [vmem:[%s784_s1 + $0x138] sm:$0xff] }
  0x13   :  { %251 = vmatpush.msrb.mxu0 %v127_v50  ;;  %271 = vmatpush.msrb.mxu1 %v128_v51  ;;  %v153_v41 = vunpack.c.l.bf16 %v58_v35  ;;  %v154_v42 = vunpack.c.h.bf16 %v58_v35  ;;  %v83_v44 = vunpack.c.l.bf16 %v23_v38  ;;  %v84_v45 = vunpack.c.h.bf16 %v23_v38  ;;  %v42_v50 = vld [vmem:[%s784_s1 + $0xf8] sm:$0xff] }
  0x14   :  { %292 = vmatpush.msrb.mxu2 %v113_v48  ;;  %312 = vmatpush.msrb.mxu3 %v114_v49  ;;  %v137_v48 = vunpack.c.l.bf16 %v50_v43  ;;  %v138_v49 = vunpack.c.h.bf16 %v50_v43  ;;  %v67_v51 = vunpack.c.l.bf16 %v15_v46  ;;  %v68_v52 = vunpack.c.h.bf16 %v15_v46 }
  0x15   :  { %550 = vmatmul.msk.f32.vlgmr.msra.gmra.mxu2 %vm156_vm0, %v645_v57  ;;  %551 = vmatmul.msk.f32.vlgmr.msra.gmra.mxu3 %vm156_vm0, %v645_v57  ;;  %v152_v55 = vunpack.c.h.bf16 %v57_v47  ;;  %v105_v63 = vunpack.c.l.bf16 %v34_v56  ;;  %v71_v16 = vunpack.c.l.bf16 %v17_v13  ;;  %v72_v17 = vunpack.c.h.bf16 %v17_v13 }
  0x16   :  { %293 = vmatpush.msrb.mxu2 %v97_v53  ;;  %313 = vmatpush.msrb.mxu3 %v98_v54  ;;  %v49_v53 = vld [vmem:[%s784_s1 + $0x130] sm:$0xff]  ;;  %v151_v54 = vunpack.c.l.bf16 %v57_v47 }
  0x17   :  { %252 = vmatpush.msrb.mxu0 %v111_v58  ;;  %272 = vmatpush.msrb.mxu1 %v112_v59  ;;  %v121_v58 = vunpack.c.l.bf16 %v42_v50  ;;  %v122_v59 = vunpack.c.h.bf16 %v42_v50  ;;  %v135_v60 = vunpack.c.l.bf16 %v49_v53 }
  0x18   :  { %294 = vmatpush.msrb.mxu2 %v81_v61  ;;  %314 = vmatpush.msrb.mxu3 %v82_v62  ;;  %v136_v61 = vunpack.c.h.bf16 %v49_v53  ;;  %v41_v62 = vld [vmem:[%s784_s1 + $0xf0] sm:$0xff] }
  0x19   :  { %253 = vmatpush.msrb.mxu0 %v95_v0  ;;  %273 = vmatpush.msrb.mxu1 %v96_v1  ;;  %v106_v0 = vunpack.c.h.bf16 %v34_v56  ;;  %v26_v1 = vld [vmem:[%s784_s1 + $0x78] sm:$0xff] }
  0x1a   :  { %295 = vmatpush.msrb.mxu2 %v65_v3  ;;  %315 = vmatpush.msrb.mxu3 %v66_v4  ;;  %v119_v3 = vunpack.c.l.bf16 %v41_v62  ;;  %v120_v4 = vunpack.c.h.bf16 %v41_v62  ;;  %v90_v7 = vunpack.c.h.bf16 %v26_v1 }
  0x1b   :  { %254 = vmatpush.msrb.mxu0 %v79_v8  ;;  %274 = vmatpush.msrb.mxu1 %v80_v9  ;;  %v103_v8 = vunpack.c.l.bf16 %v33_v2  ;;  %v104_v9 = vunpack.c.h.bf16 %v33_v2 }
  0x1c   :  { %370 = vmatpush.msra.mxu2 %v149_v5  ;;  %390 = vmatpush.msra.mxu3 %v150_v6  ;;  %v18_v5 = vld [vmem:[%s784_s1 + $0x38] sm:$0xff]  ;;  %v89_v6 = vunpack.c.l.bf16 %v26_v1 }
  0x1d   :  { %548 = vmatmul.msk.f32.vlgmr.msra.gmra.mxu0 %vm156_vm0, %v645_v57  ;;  %549 = vmatmul.msk.f32.vlgmr.msra.gmra.mxu1 %vm156_vm0, %v645_v57 }
  0x1e   :  { %371 = vmatpush.msra.mxu2 %v133_v11  ;;  %391 = vmatpush.msra.mxu3 %v134_v12  ;;  %v73_v11 = vunpack.c.l.bf16 %v18_v5  ;;  %v74_v12 = vunpack.c.h.bf16 %v18_v5 }
  0x1f   :  { %255 = vmatpush.msrb.mxu0 %v63_v14  ;;  %275 = vmatpush.msrb.mxu1 %v64_v15  ;;  %v87_v14 = vunpack.c.l.bf16 %v25_v10  ;;  %v88_v15 = vunpack.c.h.bf16 %v25_v10 }
  0x20   :  { %554 = vmatmul.msk.f32.vlgmr.msrb.gmra.mxu2 %vm156_vm0, %v645_v57  ;;  %555 = vmatmul.msk.f32.vlgmr.msrb.gmra.mxu3 %vm156_vm0, %v645_v57 }
  0x21   :  { %330 = vmatpush.msra.mxu0 %v147_v18  ;;  %350 = vmatpush.msra.mxu1 %v148_v19 }
  0x22   :  { %372 = vmatpush.msra.mxu2 %v117_v21  ;;  %392 = vmatpush.msra.mxu3 %v118_v22 }
  0x23   :  { %331 = vmatpush.msra.mxu0 %v131_v24  ;;  %351 = vmatpush.msra.mxu1 %v132_v25 }
  0x24   :  { %373 = vmatpush.msra.mxu2 %v101_v27  ;;  %393 = vmatpush.msra.mxu3 %v102_v28 }
  0x25   :  { %332 = vmatpush.msra.mxu0 %v115_v29  ;;  %352 = vmatpush.msra.mxu1 %v116_v30 }
  0x26   :  { %374 = vmatpush.msra.mxu2 %v85_v32  ;;  %394 = vmatpush.msra.mxu3 %v86_v33 }
  0x27   :  { %552 = vmatmul.msk.f32.vlgmr.msrb.gmra.mxu0 %vm156_vm0, %v645_v57  ;;  %553 = vmatmul.msk.f32.vlgmr.msrb.gmra.mxu1 %vm156_vm0, %v645_v57 }
  0x28   :  { %333 = vmatpush.msra.mxu0 %v99_v36  ;;  %353 = vmatpush.msra.mxu1 %v100_v37 }
  0x29   :  { %375 = vmatpush.msra.mxu2 %v69_v39  ;;  %395 = vmatpush.msra.mxu3 %v70_v40 }
  0x2a   :  { %334 = vmatpush.msra.mxu0 %v83_v44  ;;  %354 = vmatpush.msra.mxu1 %v84_v45 }
  0x2b   :  { %450 = vmatpush.msrb.mxu2 %v153_v41  ;;  %470 = vmatpush.msrb.mxu3 %v154_v42 }
  0x2c   :  { %558 = vmatmul.msk.f32.vlgmr.msra.gmra.mxu2 %vm156_vm0, %v645_v57  ;;  %559 = vmatmul.msk.f32.vlgmr.msra.gmra.mxu3 %vm156_vm0, %v645_v57 }
  0x2d   :  { %451 = vmatpush.msrb.mxu2 %v137_v48  ;;  %471 = vmatpush.msrb.mxu3 %v138_v49 }
  0x2e   :  { %335 = vmatpush.msra.mxu0 %v67_v51  ;;  %355 = vmatpush.msra.mxu1 %v68_v52 }
  0x2f   :  { %452 = vmatpush.msrb.mxu2 %v121_v58  ;;  %472 = vmatpush.msrb.mxu3 %v122_v59 }
  0x30   :  { %410 = vmatpush.msrb.mxu0 %v151_v54  ;;  %430 = vmatpush.msrb.mxu1 %v152_v55 }
  0x31   :  { %453 = vmatpush.msrb.mxu2 %v105_v63  ;;  %473 = vmatpush.msrb.mxu3 %v106_v0 }
  0x32   :  { %411 = vmatpush.msrb.mxu0 %v135_v60  ;;  %431 = vmatpush.msrb.mxu1 %v136_v61 }
  0x33   :  { %556 = vmatmul.msk.f32.vlgmr.msra.gmra.mxu0 %vm156_vm0, %v645_v57  ;;  %557 = vmatmul.msk.f32.vlgmr.msra.gmra.mxu1 %vm156_vm0, %v645_v57 }
  0x34   :  { %412 = vmatpush.msrb.mxu0 %v119_v3  ;;  %432 = vmatpush.msrb.mxu1 %v120_v4 }
  0x35   :  { %454 = vmatpush.msrb.mxu2 %v89_v6  ;;  %474 = vmatpush.msrb.mxu3 %v90_v7 }
  0x36   :  { %413 = vmatpush.msrb.mxu0 %v103_v8  ;;  %433 = vmatpush.msrb.mxu1 %v104_v9 }
  0x37   :  { %455 = vmatpush.msrb.mxu2 %v73_v11  ;;  %475 = vmatpush.msrb.mxu3 %v74_v12 }
  0x38   :  { %562 = vmatmul.msk.f32.vlgmr.msrb.gmra.mxu2 %vm156_vm0, %v645_v57  ;;  %563 = vmatmul.msk.f32.vlgmr.msrb.gmra.mxu3 %vm156_vm0, %v645_v57 }
  0x39   :  { %414 = vmatpush.msrb.mxu0 %v87_v14  ;;  %434 = vmatpush.msrb.mxu1 %v88_v15 }
  0x3b   :  { %415 = vmatpush.msrb.mxu0 %v71_v16  ;;  %435 = vmatpush.msrb.mxu1 %v72_v17 }
  0x3c   :  { %560 = vmatmul.msk.f32.vlgmr.msrb.gmra.mxu0 %vm156_vm0, %v645_v57  ;;  %561 = vmatmul.msk.f32.vlgmr.msrb.gmra.mxu1 %vm156_vm0, %v645_v57 }
  0x98   :  { %v217_v18 = vpop.f32.mrf.mxu2  ;;  %v237_v19 = vpop.f32.mrf.mxu3 }
  0x99   :  { %vm482_vm1 = vcmp.ge.f32.partialorder %v217_v18, 0.0  ;;  %v498_v22 = vmul.f32 0.2, %v217_v18  ;;  %vm483_vm2 = vcmp.ge.f32.partialorder %v237_v19, 0.0  ;;  %v499_v23 = vmul.f32 0.2, %v237_v19 }
  0x9a   :  { %v177_v20 = vpop.f32.mrf.mxu0  ;;  %v197_v21 = vpop.f32.mrf.mxu1 }
  0x9b   :  { %vm480_vm3 = vcmp.ge.f32.partialorder %v177_v20, 0.0  ;;  %v496_v24 = vmul.f32 0.2, %v177_v20  ;;  %vm481_vm4 = vcmp.ge.f32.partialorder %v197_v21, 0.0  ;;  %v497_v25 = vmul.f32 0.2, %v197_v21 }
  0x9c   :  { %v514_v26 = vsel %vm482_vm1, %v217_v18, %v498_v22  ;;  %v515_v27 = vsel %vm483_vm2, %v237_v19, %v499_v23 }
  0x9d   :  { %v512_v28 = vsel %vm480_vm3, %v177_v20, %v496_v24  ;;  %v513_v29 = vsel %vm481_vm4, %v197_v21, %v497_v25  ;;  %v529_v30 = vpack.c.bf16 %v515_v27, %v514_v26 }
  0x9e   :  { %v528_v31 = vpack.c.bf16 %v513_v29, %v512_v28 }
  0x9f   :  { %537 = vst [vmem:[%s786_s2 + $0x8] sm:$0xff] %v529_v30 }
  0xa0   :  { %536 = vst [vmem:[%s786_s2] sm:$0xff] %v528_v31 }
  0xa3   :  { %v297_v57 = vpop.f32.mrf.mxu2  ;;  %v317_v32 = vpop.f32.mrf.mxu3 }
  0xa4   :  { %v257_v33 = vpop.f32.mrf.mxu0  ;;  %v277_v34 = vpop.f32.mrf.mxu1  ;;  %vm486_vm5 = vcmp.ge.f32.partialorder %v297_v57, 0.0  ;;  %v502_v35 = vmul.f32 0.2, %v297_v57  ;;  %vm487_vm6 = vcmp.ge.f32.partialorder %v317_v32, 0.0  ;;  %v503_v36 = vmul.f32 0.2, %v317_v32 }
  0xa5   :  { %vm484_vm7 = vcmp.ge.f32.partialorder %v257_v33, 0.0  ;;  %v500_v37 = vmul.f32 0.2, %v257_v33  ;;  %vm485_vm8 = vcmp.ge.f32.partialorder %v277_v34, 0.0  ;;  %v501_v38 = vmul.f32 0.2, %v277_v34 }
  0xa6   :  { %v518_v39 = vsel %vm486_vm5, %v297_v57, %v502_v35  ;;  %v519_v40 = vsel %vm487_vm6, %v317_v32, %v503_v36 }
  0xa7   :  { %v516_v41 = vsel %vm484_vm7, %v257_v33, %v500_v37  ;;  %v517_v42 = vsel %vm485_vm8, %v277_v34, %v501_v38  ;;  %v531_v43 = vpack.c.bf16 %v519_v40, %v518_v39 }
  0xa8   :  { %v530_v44 = vpack.c.bf16 %v517_v42, %v516_v41 }
  0xa9   :  { %539 = vst [vmem:[%s786_s2 + $0x18] sm:$0xff] %v531_v43 }
  0xaa   :  { %538 = vst [vmem:[%s786_s2 + $0x10] sm:$0xff] %v530_v44 }
  0xaf   :  { %v377_v45 = vpop.f32.mrf.mxu2  ;;  %v397_v46 = vpop.f32.mrf.mxu3 }
  0xb0   :  { %v337_v47 = vpop.f32.mrf.mxu0  ;;  %v357_v48 = vpop.f32.mrf.mxu1  ;;  %vm490_vm9 = vcmp.ge.f32.partialorder %v377_v45, 0.0  ;;  %v506_v49 = vmul.f32 0.2, %v377_v45  ;;  %vm491_vm10 = vcmp.ge.f32.partialorder %v397_v46, 0.0  ;;  %v507_v50 = vmul.f32 0.2, %v397_v46 }
  0xb1   :  { %vm488_vm11 = vcmp.ge.f32.partialorder %v337_v47, 0.0  ;;  %v504_v51 = vmul.f32 0.2, %v337_v47  ;;  %vm489_vm12 = vcmp.ge.f32.partialorder %v357_v48, 0.0  ;;  %v505_v52 = vmul.f32 0.2, %v357_v48 }
  0xb2   :  { %v522_v53 = vsel %vm490_vm9, %v377_v45, %v506_v49  ;;  %v523_v54 = vsel %vm491_vm10, %v397_v46, %v507_v50 }
  0xb3   :  { %v520_v55 = vsel %vm488_vm11, %v337_v47, %v504_v51  ;;  %v521_v56 = vsel %vm489_vm12, %v357_v48, %v505_v52  ;;  %v533_v58 = vpack.c.bf16 %v523_v54, %v522_v53 }
  0xb4   :  { %v532_v59 = vpack.c.bf16 %v521_v56, %v520_v55 }
  0xb5   :  { %541 = vst [vmem:[%s786_s2 + $0x28] sm:$0xff] %v533_v58 }
  0xb6   :  { %540 = vst [vmem:[%s786_s2 + $0x20] sm:$0xff] %v532_v59 }
  0xb9   :  { %v417_v60 = vpop.f32.mrf.mxu0  ;;  %v437_v61 = vpop.f32.mrf.mxu1 }
  0xba   :  { %vm492_vm13 = vcmp.ge.f32.partialorder %v417_v60, 0.0  ;;  %v508_v62 = vmul.f32 0.2, %v417_v60  ;;  %vm493_vm14 = vcmp.ge.f32.partialorder %v437_v61, 0.0  ;;  %v509_v63 = vmul.f32 0.2, %v437_v61 }
  0xbb   :  { %v457_v0 = vpop.f32.mrf.mxu2  ;;  %v477_v1 = vpop.f32.mrf.mxu3 }
  0xbc   :  { %v524_v2 = vsel %vm492_vm13, %v417_v60, %v508_v62  ;;  %v525_v3 = vsel %vm493_vm14, %v437_v61, %v509_v63  ;;  %vm494_vm15 = vcmp.ge.f32.partialorder %v457_v0, 0.0  ;;  %v510_v4 = vmul.f32 0.2, %v457_v0 }
  0xbd   :  { %v534_v5 = vpack.c.bf16 %v525_v3, %v524_v2  ;;  %vm495_vm0 = vcmp.ge.f32.partialorder %v477_v1, 0.0  ;;  %v511_v6 = vmul.f32 0.2, %v477_v1 }
  0xbe   :  { %v526_v7 = vsel %vm494_vm15, %v457_v0, %v510_v4 }
  0xbf   :  { %542 = vst [vmem:[%s786_s2 + $0x30] sm:$0xff] %v534_v5  ;;  %v527_v8 = vsel %vm495_vm0, %v477_v1, %v511_v6 }
  0xc0   :  { %v535_v9 = vpack.c.bf16 %v527_v8, %v526_v7 }
  0xc2   :  { %543 = vst [vmem:[%s786_s2 + $0x38] sm:$0xff] %v535_v9 }

// kernel: discriminator_forward.5
= control target key start
LH: loop header
LB: loop body
LE: loop exit
PB: predicated region body
PF: predicated region fallthrough
CT: control target
= control target key end

     0   :  { %s547_s1 = inlined_call_operand.vmem [shape: bf16[128,512], index: 1, kind: input, shape index: {}]   ;;  %s548_s0 = inlined_call_operand.vmem [shape: f32[16,128], index: 0, kind: input, shape index: {}]   ;;  %s549_s3 = inlined_call_operand.vmem [shape: f32[16,1], index: 3, kind: input, shape index: {}]   ;;  %s550_s2 = inlined_call_operand.vmem [shape: f32[16,1], index: 2, kind: input, shape index: {}]   ;;  %s551_s4 = inlined_call_operand.vmem [shape: bf16[16,512], index: 4, kind: output, shape index: {}]  }
   0x1   :  { %v48_v0 = vld [vmem:[%s547_s1 + $0xf8] sm:$0xff]  ;;  %v46_v1 = vld [vmem:[%s547_s1 + $0xe8] sm:$0xff]  ;;  %v47_v2 = vld [vmem:[%s547_s1 + $0xf0] sm:$0xff] }
   0x2   :  { %v111_v3 = vunpack.c.l.bf16 %v48_v0  ;;  %v107_v4 = vunpack.c.l.bf16 %v46_v1  ;;  %v112_v5 = vunpack.c.h.bf16 %v48_v0  ;;  %v109_v6 = vunpack.c.l.bf16 %v47_v2  ;;  %v44_v7 = vld [vmem:[%s547_s1 + $0xd8] sm:$0xff]  ;;  %v45_v8 = vld [vmem:[%s547_s1 + $0xe0] sm:$0xff]  ;;  %v42_v12 = vld [vmem:[%s547_s1 + $0xc8] sm:$0xff] }
   0x3   :  { %v110_v9 = vunpack.c.h.bf16 %v47_v2  ;;  %v108_v10 = vunpack.c.h.bf16 %v46_v1  ;;  %v105_v11 = vunpack.c.l.bf16 %v45_v8  ;;  %v43_v13 = vld [vmem:[%s547_s1 + $0xd0] sm:$0xff]  ;;  %v103_v14 = vunpack.c.l.bf16 %v44_v7  ;;  %v41_v17 = vld [vmem:[%s547_s1 + $0xc0] sm:$0xff]  ;;  %v40_v20 = vld [vmem:[%s547_s1 + $0xb8] sm:$0xff] }
   0x4   :  { %161 = vmatpush.msra.mxu2 %v111_v3  ;;  %184 = vmatpush.msra.mxu3 %v112_v5  ;;  %v106_v15 = vunpack.c.h.bf16 %v45_v8  ;;  %v104_v16 = vunpack.c.h.bf16 %v44_v7  ;;  %v101_v18 = vunpack.c.l.bf16 %v43_v13  ;;  %v102_v19 = vunpack.c.h.bf16 %v43_v13  ;;  %v39_v23 = vld [vmem:[%s547_s1 + $0xb0] sm:$0xff]  ;;  %v38_v26 = vld [vmem:[%s547_s1 + $0xa8] sm:$0xff]  ;;  %v37_v29 = vld [vmem:[%s547_s1 + $0xa0] sm:$0xff] }
   0x5   :  { %115 = vmatpush.msra.mxu0 %v109_v6  ;;  %138 = vmatpush.msra.mxu1 %v110_v9  ;;  %v99_v21 = vunpack.c.l.bf16 %v42_v12  ;;  %v100_v22 = vunpack.c.h.bf16 %v42_v12  ;;  %v97_v24 = vunpack.c.l.bf16 %v41_v17  ;;  %v98_v25 = vunpack.c.h.bf16 %v41_v17  ;;  %v36_v32 = vld [vmem:[%s547_s1 + $0x98] sm:$0xff]  ;;  %v35_v35 = vld [vmem:[%s547_s1 + $0x90] sm:$0xff]  ;;  %v34_v38 = vld [vmem:[%s547_s1 + $0x88] sm:$0xff] }
   0x6   :  { %162 = vmatpush.msra.mxu2 %v107_v4  ;;  %185 = vmatpush.msra.mxu3 %v108_v10  ;;  %v95_v27 = vunpack.c.l.bf16 %v40_v20  ;;  %v96_v28 = vunpack.c.h.bf16 %v40_v20  ;;  %v93_v30 = vunpack.c.l.bf16 %v39_v23  ;;  %v94_v31 = vunpack.c.h.bf16 %v39_v23  ;;  %v33_v41 = vld [vmem:[%s547_s1 + $0x80] sm:$0xff]  ;;  %v32_v44 = vld [vmem:[%s547_s1 + $0x78] sm:$0xff]  ;;  %v31_v47 = vld [vmem:[%s547_s1 + $0x70] sm:$0xff] }
   0x7   :  { %116 = vmatpush.msra.mxu0 %v105_v11  ;;  %139 = vmatpush.msra.mxu1 %v106_v15  ;;  %v91_v33 = vunpack.c.l.bf16 %v38_v26  ;;  %v92_v34 = vunpack.c.h.bf16 %v38_v26  ;;  %v89_v36 = vunpack.c.l.bf16 %v37_v29  ;;  %v90_v37 = vunpack.c.h.bf16 %v37_v29  ;;  %v30_v50 = vld [vmem:[%s547_s1 + $0x68] sm:$0xff]  ;;  %v29_v53 = vld [vmem:[%s547_s1 + $0x60] sm:$0xff]  ;;  %v28_v56 = vld [vmem:[%s547_s1 + $0x58] sm:$0xff] }
   0x8   :  { %163 = vmatpush.msra.mxu2 %v103_v14  ;;  %186 = vmatpush.msra.mxu3 %v104_v16  ;;  %v87_v39 = vunpack.c.l.bf16 %v36_v32  ;;  %v88_v40 = vunpack.c.h.bf16 %v36_v32  ;;  %v85_v42 = vunpack.c.l.bf16 %v35_v35  ;;  %v86_v43 = vunpack.c.h.bf16 %v35_v35  ;;  %v27_v59 = vld [vmem:[%s547_s1 + $0x50] sm:$0xff]  ;;  %v26_v62 = vld [vmem:[%s547_s1 + $0x48] sm:$0xff]  ;;  %v25_v1 = vld [vmem:[%s547_s1 + $0x40] sm:$0xff] }
   0x9   :  { %117 = vmatpush.msra.mxu0 %v101_v18  ;;  %140 = vmatpush.msra.mxu1 %v102_v19  ;;  %v83_v45 = vunpack.c.l.bf16 %v34_v38  ;;  %v84_v46 = vunpack.c.h.bf16 %v34_v38  ;;  %v81_v48 = vunpack.c.l.bf16 %v33_v41  ;;  %v82_v49 = vunpack.c.h.bf16 %v33_v41  ;;  %v24_v4 = vld [vmem:[%s547_s1 + $0x38] sm:$0xff]  ;;  %v23_v7 = vld [vmem:[%s547_s1 + $0x30] sm:$0xff]  ;;  %v22_v10 = vld [vmem:[%s547_s1 + $0x28] sm:$0xff] }
   0xa   :  { %164 = vmatpush.msra.mxu2 %v99_v21  ;;  %187 = vmatpush.msra.mxu3 %v100_v22  ;;  %v79_v51 = vunpack.c.l.bf16 %v32_v44  ;;  %v80_v52 = vunpack.c.h.bf16 %v32_v44  ;;  %v77_v54 = vunpack.c.l.bf16 %v31_v47  ;;  %v78_v55 = vunpack.c.h.bf16 %v31_v47  ;;  %v21_v13 = vld [vmem:[%s547_s1 + $0x20] sm:$0xff]  ;;  %v20_v16 = vld [vmem:[%s547_s1 + $0x18] sm:$0xff]  ;;  %v19_v19 = vld [vmem:[%s547_s1 + $0x10] sm:$0xff] }
   0xb   :  { %118 = vmatpush.msra.mxu0 %v97_v24  ;;  %141 = vmatpush.msra.mxu1 %v98_v25  ;;  %v75_v57 = vunpack.c.l.bf16 %v30_v50  ;;  %v76_v58 = vunpack.c.h.bf16 %v30_v50  ;;  %v73_v60 = vunpack.c.l.bf16 %v29_v53  ;;  %v74_v61 = vunpack.c.h.bf16 %v29_v53  ;;  %v18_v22 = vld [vmem:[%s547_s1 + $0x8] sm:$0xff] }
   0xc   :  { %165 = vmatpush.msra.mxu2 %v95_v27  ;;  %188 = vmatpush.msra.mxu3 %v96_v28  ;;  %v71_v63 = vunpack.c.l.bf16 %v28_v56  ;;  %v72_v0 = vunpack.c.h.bf16 %v28_v56  ;;  %v69_v2 = vunpack.c.l.bf16 %v27_v59  ;;  %v70_v3 = vunpack.c.h.bf16 %v27_v59  ;;  %v17_v27 = vld [vmem:[%s547_s1] sm:$0xff] }
   0xd   :  { %119 = vmatpush.msra.mxu0 %v93_v30  ;;  %142 = vmatpush.msra.mxu1 %v94_v31  ;;  %v67_v5 = vunpack.c.l.bf16 %v26_v62  ;;  %v68_v6 = vunpack.c.h.bf16 %v26_v62  ;;  %v65_v8 = vunpack.c.l.bf16 %v25_v1  ;;  %v66_v9 = vunpack.c.h.bf16 %v25_v1  ;;  %v113_v30 = vld [vmem:[%s548_s0] sm:$0xff] }
   0xe   :  { %166 = vmatpush.msra.mxu2 %v91_v33  ;;  %189 = vmatpush.msra.mxu3 %v92_v34  ;;  %v63_v11 = vunpack.c.l.bf16 %v24_v4  ;;  %v64_v12 = vunpack.c.h.bf16 %v24_v4  ;;  %v61_v14 = vunpack.c.l.bf16 %v23_v7  ;;  %v62_v15 = vunpack.c.h.bf16 %v23_v7  ;;  %v114_v33 = vld [vmem:[%s548_s0 + $0x8] sm:$0xff] }
   0xf   :  { %120 = vmatpush.msra.mxu0 %v89_v36  ;;  %143 = vmatpush.msra.mxu1 %v90_v37  ;;  %v59_v17 = vunpack.c.l.bf16 %v22_v10  ;;  %v60_v18 = vunpack.c.h.bf16 %v22_v10  ;;  %v57_v20 = vunpack.c.l.bf16 %v21_v13  ;;  %v58_v21 = vunpack.c.h.bf16 %v21_v13 }
  0x10   :  { %167 = vmatpush.msra.mxu2 %v87_v39  ;;  %190 = vmatpush.msra.mxu3 %v88_v40  ;;  %v55_v23 = vunpack.c.l.bf16 %v20_v16  ;;  %v56_v24 = vunpack.c.h.bf16 %v20_v16  ;;  %v53_v25 = vunpack.c.l.bf16 %v19_v19  ;;  %v54_v26 = vunpack.c.h.bf16 %v19_v19 }
  0x11   :  { %121 = vmatpush.msra.mxu0 %v85_v42  ;;  %144 = vmatpush.msra.mxu1 %v86_v43  ;;  %v51_v28 = vunpack.c.l.bf16 %v18_v22  ;;  %v52_v29 = vunpack.c.h.bf16 %v18_v22  ;;  %v49_v31 = vunpack.c.l.bf16 %v17_v27  ;;  %v50_v32 = vunpack.c.h.bf16 %v17_v27 }
  0x12   :  { %168 = vmatpush.msra.mxu2 %v83_v45  ;;  %191 = vmatpush.msra.mxu3 %v84_v46  ;;  %v355_v10 = vmov 0  }
  0x13   :  { %122 = vmatpush.msra.mxu0 %v81_v48  ;;  %145 = vmatpush.msra.mxu1 %v82_v49 }
  0x14   :  { %169 = vmatpush.msra.mxu2 %v79_v51  ;;  %192 = vmatpush.msra.mxu3 %v80_v52 }
  0x15   :  { %123 = vmatpush.msra.mxu0 %v77_v54  ;;  %146 = vmatpush.msra.mxu1 %v78_v55 }
  0x16   :  { %170 = vmatpush.msra.mxu2 %v75_v57  ;;  %193 = vmatpush.msra.mxu3 %v76_v58 }
  0x17   :  { %124 = vmatpush.msra.mxu0 %v73_v60  ;;  %147 = vmatpush.msra.mxu1 %v74_v61 }
  0x18   :  { %171 = vmatpush.msra.mxu2 %v71_v63  ;;  %194 = vmatpush.msra.mxu3 %v72_v0 }
  0x19   :  { %125 = vmatpush.msra.mxu0 %v69_v2  ;;  %148 = vmatpush.msra.mxu1 %v70_v3 }
  0x1a   :  { %172 = vmatpush.msra.mxu2 %v67_v5  ;;  %195 = vmatpush.msra.mxu3 %v68_v6 }
  0x1b   :  { %126 = vmatpush.msra.mxu0 %v65_v8  ;;  %149 = vmatpush.msra.mxu1 %v66_v9 }
  0x1c   :  { %173 = vmatpush.msra.mxu2 %v63_v11  ;;  %196 = vmatpush.msra.mxu3 %v64_v12  ;;  %v291_v11 = vld [vmem:[%s549_s3] sm:$0xff]  ;;  %v292_v12 = vld [vmem:[%s549_s3 + $0x8] sm:$0xff] }
  0x1d   :  { %127 = vmatpush.msra.mxu0 %v61_v14  ;;  %150 = vmatpush.msra.mxu1 %v62_v15 }
  0x1e   :  { %174 = vmatpush.msra.mxu2 %v59_v17  ;;  %197 = vmatpush.msra.mxu3 %v60_v18 }
  0x1f   :  { %128 = vmatpush.msra.mxu0 %v57_v20  ;;  %151 = vmatpush.msra.mxu1 %v58_v21 }
  0x20   :  { %175 = vmatpush.msra.mxu2 %v55_v23  ;;  %198 = vmatpush.msra.mxu3 %v56_v24 }
  0x21   :  { %129 = vmatpush.msra.mxu0 %v53_v25  ;;  %152 = vmatpush.msra.mxu1 %v54_v26  ;;  %v247_v26 = vld [vmem:[%s550_s2] sm:$0xff] }
  0x22   :  { %176 = vmatpush.msra.mxu2 %v51_v28  ;;  %199 = vmatpush.msra.mxu3 %v52_v29 }
  0x23   :  { %177 = vmatmul.f32.vlgmr.msra.gmra.mxu2 %v113_v30  ;;  %200 = vmatmul.f32.vlgmr.msra.gmra.mxu3 %v113_v30 }
  0x24   :  { %130 = vmatpush.msra.mxu0 %v49_v31  ;;  %153 = vmatpush.msra.mxu1 %v50_v32 }
  0x25   :  { %131 = vmatmul.f32.vlgmr.msra.gmra.mxu0 %v113_v30  ;;  %154 = vmatmul.f32.vlgmr.msra.gmra.mxu1 %v113_v30 }
  0x26   :  { %349 = vset.pattern.permute.xlu0 %v355_v10  ;;  %350 = vset.pattern.permute.xlu1 %v355_v10 }
  0x27   :  { %348 = vset.pattern.permute.xlu2 %v355_v10 }
  0x2b   :  { %180 = vmatmul.f32.gmra.mxu2 %v114_v33  ;;  %203 = vmatmul.f32.gmra.mxu3 %v114_v33 }
  0x2d   :  { %134 = vmatmul.f32.gmra.mxu0 %v114_v33  ;;  %157 = vmatmul.f32.gmra.mxu1 %v114_v33  ;;  %v248_v33 = vld [vmem:[%s550_s2 + $0x8] sm:$0xff] }
  0xa2   :  { %v132_v34 = vpop.f32.mrf.mxu0  ;;  %v155_v35 = vpop.f32.mrf.mxu1 }
  0xa3   :  { %v207_v36 = vadd.f32 %v155_v35, %v132_v34 }
  0xa6   :  { %v178_v37 = vpop.f32.mrf.mxu2  ;;  %v201_v38 = vpop.f32.mrf.mxu3 }
  0xa7   :  { %v208_v39 = vadd.f32 %v207_v36, %v178_v37 }
  0xa9   :  { %v209_v40 = vadd.f32 %v208_v39, %v201_v38 }
  0xaa   :  { %v135_v41 = vpop.f32.mrf.mxu0  ;;  %v158_v42 = vpop.f32.mrf.mxu1 }
  0xab   :  { %210 = vadd.xlane.f32.xlu0 %v209_v40  ;;  %v212_v43 = vadd.f32 %v158_v42, %v135_v41 }
  0xae   :  { %v181_v44 = vpop.f32.mrf.mxu2  ;;  %v204_v45 = vpop.f32.mrf.mxu3 }
  0xaf   :  { %v213_v46 = vadd.f32 %v212_v43, %v181_v44 }
  0xb1   :  { %v214_v47 = vadd.f32 %v213_v46, %v204_v45 }
  0xb3   :  { %215 = vadd.xlane.f32.xlu0 %v214_v47 }
  0xc7   :  { %295 = vperm.xlu0 %349, %v291_v11  }
 0x11e   :  { %v211_v48 = vpop.xlane.xlu0 %210 }
 0x11f   :  { %v217_v49 = vmul.f32 0.001953125, %v211_v48 }
 0x121   :  { %v483_v50 = vsub.f32 %v132_v34, %v217_v49  ;;  %v485_v51 = vsub.f32 %v155_v35, %v217_v49  ;;  %v487_v52 = vsub.f32 %v178_v37, %v217_v49  ;;  %v489_v53 = vsub.f32 %v201_v38, %v217_v49 }
 0x123   :  { %v227_v54 = vmul.f32 %v483_v50, %v483_v50  ;;  %v228_v55 = vmul.f32 %v485_v51, %v485_v51  ;;  %v229_v56 = vmul.f32 %v487_v52, %v487_v52  ;;  %v230_v60 = vmul.f32 %v489_v53, %v489_v53 }
 0x125   :  { %v235_v57 = vadd.f32 %v228_v55, %v227_v54 }
 0x126   :  { %v216_v58 = vpop.xlane.xlu0 %215 }
 0x127   :  { %v218_v59 = vmul.f32 0.001953125, %v216_v58  ;;  %v236_v61 = vadd.f32 %v235_v57, %v229_v56 }
 0x129   :  { %v499_v62 = vsub.f32 %v135_v41, %v218_v59  ;;  %v501_v63 = vsub.f32 %v158_v42, %v218_v59  ;;  %v237_v0 = vadd.f32 %v236_v61, %v230_v60  ;;  %v503_v1 = vsub.f32 %v181_v44, %v218_v59 }
 0x12a   :  { %v505_v2 = vsub.f32 %v204_v45, %v218_v59 }
 0x12b   :  { %238 = vadd.xlane.f32.xlu1 %v237_v0  ;;  %v231_v3 = vmul.f32 %v499_v62, %v499_v62  ;;  %v232_v4 = vmul.f32 %v501_v63, %v501_v63  ;;  %v233_v5 = vmul.f32 %v503_v1, %v503_v1 }
 0x12c   :  { %v234_v7 = vmul.f32 %v505_v2, %v505_v2 }
 0x12d   :  { %v240_v6 = vadd.f32 %v232_v4, %v231_v3 }
 0x12f   :  { %v241_v8 = vadd.f32 %v240_v6, %v233_v5 }
 0x131   :  { %v242_v9 = vadd.f32 %v241_v8, %v234_v7 }
 0x133   :  { %243 = vadd.xlane.f32.xlu1 %v242_v9 }
 0x139   :  { %v296_v38 = vpop.permute.xlu0 %295 }
 0x14c   :  { %300 = vperm.xlu1 %350, %v292_v12  }
 0x19e   :  { %v239_v13 = vpop.xlane.xlu1 %238 }
 0x19f   :  { %v245_v14 = vmul.f32 0.001953125, %v239_v13 }
 0x1a1   :  { %v249_v15 = vadd.f32 1e-05, %v245_v14 }
 0x1a3   :  { %351 = vrsqrt.f32 %v249_v15  ;;  %vm257_vm1 = vweird.f32 %v249_v15 }
 0x1a6   :  { %v244_v16 = vpop.xlane.xlu1 %243 }
 0x1a7   :  { %v246_v17 = vmul.f32 0.001953125, %v244_v16 }
 0x1a9   :  { %v352_v18 = vpop.eup %351  ;;  %v250_v19 = vadd.f32 1e-05, %v246_v17 }
 0x1aa   :  { %v252_v20 = vmul.f32 %v352_v18, %v249_v15  ;;  %vm258_vm0 = vweird.f32 %v352_v18 }
 0x1ab   :  { %353 = vrsqrt.f32 %v250_v19  ;;  %vm259_vm2 = vmor %vm257_vm1, %vm258_vm0  ;;  %vm267_vm4 = vweird.f32 %v250_v19 }
 0x1ac   :  { %v253_v21 = vmul.f32 %v352_v18, %v252_v20 }
 0x1ae   :  { %v254_v22 = vmul.f32 0.5, %v253_v21 }
 0x1b0   :  { %v255_v23 = vsub.f32 1.5, %v254_v22 }
 0x1b1   :  { %v354_v24 = vpop.eup %353 }
 0x1b2   :  { %v262_v25 = vmul.f32 %v354_v24, %v250_v19  ;;  %v256_v27 = vmul.f32 %v352_v18, %v255_v23  ;;  %vm268_vm3 = vweird.f32 %v354_v24 }
 0x1b3   :  { %vm269_vm5 = vmor %vm267_vm4, %vm268_vm3 }
 0x1b4   :  { %v263_v28 = vmul.f32 %v354_v24, %v262_v25  ;;  %v260_v29 = vsel %vm259_vm2, %v352_v18, %v256_v27 }
 0x1b5   :  { %v271_v30 = vmul.f32 %v260_v29, %v247_v26 }
 0x1b6   :  { %v264_v31 = vmul.f32 0.5, %v263_v28 }
 0x1b7   :  { %275 = vperm.xlu2 %348, %v271_v30  }
 0x1b8   :  { %v265_v32 = vsub.f32 1.5, %v264_v31 }
 0x1ba   :  { %v266_v34 = vmul.f32 %v354_v24, %v265_v32 }
 0x1bc   :  { %v270_v35 = vsel %vm269_vm5, %v354_v24, %v266_v34 }
 0x1bd   :  { %v272_v36 = vmul.f32 %v270_v35, %v248_v33 }
 0x1be   :  { %v301_v57 = vpop.permute.xlu1 %300 }
 0x1bf   :  { %280 = vperm.xlu2 %348, %v272_v36  }
 0x211   :  { %v276_v37 = vpop.permute.xlu2 %275 }
 0x212   :  { %v283_v39 = vmul.f32 %v276_v37, %v483_v50  ;;  %v284_v40 = vmul.f32 %v276_v37, %v485_v51  ;;  %v285_v41 = vmul.f32 %v276_v37, %v487_v52  ;;  %v286_v42 = vmul.f32 %v276_v37, %v489_v53 }
 0x214   :  { %v303_v43 = vadd.f32 %v296_v38, %v283_v39  ;;  %v304_v44 = vadd.f32 %v296_v38, %v284_v40  ;;  %v305_v45 = vadd.f32 %v296_v38, %v285_v41  ;;  %v306_v46 = vadd.f32 %v296_v38, %v286_v42 }
 0x216   :  { %vm311_vm6 = vcmp.ge.f32.partialorder %v303_v43, 0.0  ;;  %vm312_vm7 = vcmp.ge.f32.partialorder %v304_v44, 0.0  ;;  %vm313_vm8 = vcmp.ge.f32.partialorder %v305_v45, 0.0  ;;  %vm314_vm9 = vcmp.ge.f32.partialorder %v306_v46, 0.0 }
 0x217   :  { %v319_v47 = vmul.f32 0.2, %v303_v43  ;;  %v320_v48 = vmul.f32 0.2, %v304_v44  ;;  %v321_v49 = vmul.f32 0.2, %v305_v45 }
 0x218   :  { %v322_v54 = vmul.f32 0.2, %v306_v46 }
 0x219   :  { %v327_v55 = vsel %vm311_vm6, %v303_v43, %v319_v47  ;;  %v328_v50 = vsel %vm312_vm7, %v304_v44, %v320_v48  ;;  %v329_v56 = vsel %vm313_vm8, %v305_v45, %v321_v49  ;;  %v281_v51 = vpop.permute.xlu2 %280 }
 0x21a   :  { %v330_v52 = vsel %vm314_vm9, %v306_v46, %v322_v54  ;;  %v335_v58 = vpack.c.bf16 %v328_v50, %v327_v55  ;;  %v287_v53 = vmul.f32 %v281_v51, %v499_v62  ;;  %v288_v59 = vmul.f32 %v281_v51, %v501_v63 }
 0x21b   :  { %v336_v60 = vpack.c.bf16 %v330_v52, %v329_v56  ;;  %v289_v61 = vmul.f32 %v281_v51, %v503_v1  ;;  %v290_v0 = vmul.f32 %v281_v51, %v505_v2 }
 0x21c   :  { %339 = vst [vmem:[%s551_s4] sm:$0xff] %v335_v58  ;;  %v307_v3 = vadd.f32 %v301_v57, %v287_v53  ;;  %v308_v4 = vadd.f32 %v301_v57, %v288_v59 }
 0x21d   :  { %340 = vst [vmem:[%s551_s4 + $0x8] sm:$0xff] %v336_v60  ;;  %v309_v5 = vadd.f32 %v301_v57, %v289_v61  ;;  %v310_v6 = vadd.f32 %v301_v57, %v290_v0 }
 0x21e   :  { %vm315_vm10 = vcmp.ge.f32.partialorder %v307_v3, 0.0  ;;  %vm316_vm11 = vcmp.ge.f32.partialorder %v308_v4, 0.0  ;;  %v323_v62 = vmul.f32 0.2, %v307_v3  ;;  %v324_v63 = vmul.f32 0.2, %v308_v4 }
 0x21f   :  { %vm317_vm12 = vcmp.ge.f32.partialorder %v309_v5, 0.0  ;;  %vm318_vm13 = vcmp.ge.f32.partialorder %v310_v6, 0.0  ;;  %v325_v1 = vmul.f32 0.2, %v309_v5  ;;  %v326_v2 = vmul.f32 0.2, %v310_v6 }
 0x220   :  { %v331_v7 = vsel %vm315_vm10, %v307_v3, %v323_v62  ;;  %v332_v8 = vsel %vm316_vm11, %v308_v4, %v324_v63 }
 0x221   :  { %v333_v9 = vsel %vm317_vm12, %v309_v5, %v325_v1  ;;  %v334_v10 = vsel %vm318_vm13, %v310_v6, %v326_v2  ;;  %v337_v11 = vpack.c.bf16 %v332_v8, %v331_v7 }
 0x222   :  { %v338_v12 = vpack.c.bf16 %v334_v10, %v333_v9 }
 0x223   :  { %341 = vst [vmem:[%s551_s4 + $0x10] sm:$0xff] %v337_v11 }
 0x224   :  { %342 = vst [vmem:[%s551_s4 + $0x18] sm:$0xff] %v338_v12 }

// kernel: discriminator_forward.6
= control target key start
LH: loop header
LB: loop body
LE: loop exit
PB: predicated region body
PF: predicated region fallthrough
CT: control target
= control target key end

     0   :  { %s589_s1 = inlined_call_operand.vmem [shape: bf16[256,128], index: 1, kind: input, shape index: {}]   ;;  %s590_s0 = inlined_call_operand.vmem [shape: f32[32,256], index: 0, kind: input, shape index: {}]   ;;  %s591_s2 = inlined_call_operand.vmem [shape: f32[32,1], index: 2, kind: input, shape index: {}]   ;;  %s592_s3 = inlined_call_operand.vmem [shape: f32[32,1], index: 3, kind: input, shape index: {}]   ;;  %s593_s4 = inlined_call_operand.vmem [shape: bf16[32,128], index: 4, kind: output, shape index: {}]  }
   0x1   :  { %v387_v0 = vld [vmem:[%s589_s1 + $0x38] sm:$0xff]   ;;  %v386_v2 = vld [vmem:[%s589_s1 + $0x30] sm:$0xff]   ;;  %v385_v10 = vld [vmem:[%s589_s1 + $0x28] sm:$0xff]  }
   0x2   :  { %v395_v1 = vld [vmem:[%s589_s1 + $0x78] sm:$0xff]   ;;  %v338_v3 = vunpack.c.h.bf16 %v387_v0  ;;  %v337_v5 = vunpack.c.l.bf16 %v387_v0  ;;  %v394_v6 = vld [vmem:[%s589_s1 + $0x70] sm:$0xff]   ;;  %v334_v8 = vunpack.c.h.bf16 %v386_v2  ;;  %v333_v11 = vunpack.c.l.bf16 %v386_v2  ;;  %v393_v12 = vld [vmem:[%s589_s1 + $0x68] sm:$0xff]  }
   0x3   :  { %v370_v4 = vunpack.c.h.bf16 %v395_v1  ;;  %v369_v7 = vunpack.c.l.bf16 %v395_v1  ;;  %v366_v9 = vunpack.c.h.bf16 %v394_v6  ;;  %v365_v13 = vunpack.c.l.bf16 %v394_v6  ;;  %v384_v16 = vld [vmem:[%s589_s1 + $0x20] sm:$0xff]   ;;  %v383_v22 = vld [vmem:[%s589_s1 + $0x18] sm:$0xff]   ;;  %v382_v28 = vld [vmem:[%s589_s1 + $0x10] sm:$0xff]  }
   0x4   :  { %89 = vmatpush.msra.mxu0 %v338_v3  ;;  %397 = vmatpush.msra.mxu2 %v338_v3  ;;  %v330_v14 = vunpack.c.h.bf16 %v385_v10  ;;  %v362_v15 = vunpack.c.h.bf16 %v393_v12  ;;  %v329_v17 = vunpack.c.l.bf16 %v385_v10  ;;  %v392_v18 = vld [vmem:[%s589_s1 + $0x60] sm:$0xff]   ;;  %v361_v19 = vunpack.c.l.bf16 %v393_v12  ;;  %v391_v24 = vld [vmem:[%s589_s1 + $0x58] sm:$0xff]   ;;  %v390_v30 = vld [vmem:[%s589_s1 + $0x50] sm:$0xff]  }
   0x5   :  { %118 = vmatpush.msra.mxu1 %v370_v4  ;;  %413 = vmatpush.msra.mxu3 %v370_v4  ;;  %v326_v20 = vunpack.c.h.bf16 %v384_v16  ;;  %v358_v21 = vunpack.c.h.bf16 %v392_v18  ;;  %v325_v23 = vunpack.c.l.bf16 %v384_v16  ;;  %v357_v25 = vunpack.c.l.bf16 %v392_v18  ;;  %v381_v34 = vld [vmem:[%s589_s1 + $0x8] sm:$0xff]   ;;  %v308_v40 = vld [vmem:[%s589_s1] sm:$0xff]   ;;  %v83_v52 = vld [vmem:[%s590_s0 + $0x10] sm:$0xff] }
   0x6   :  { %90 = vmatpush.msra.mxu0 %v337_v5  ;;  %398 = vmatpush.msra.mxu2 %v337_v5  ;;  %v322_v26 = vunpack.c.h.bf16 %v383_v22  ;;  %v354_v27 = vunpack.c.h.bf16 %v391_v24  ;;  %v321_v29 = vunpack.c.l.bf16 %v383_v22  ;;  %v353_v31 = vunpack.c.l.bf16 %v391_v24  ;;  %v389_v36 = vld [vmem:[%s589_s1 + $0x48] sm:$0xff]   ;;  %v388_v42 = vld [vmem:[%s589_s1 + $0x40] sm:$0xff]   ;;  %v87_v53 = vld [vmem:[%s590_s0 + $0x30] sm:$0xff] }
   0x7   :  { %119 = vmatpush.msra.mxu1 %v369_v7  ;;  %414 = vmatpush.msra.mxu3 %v369_v7  ;;  %v318_v32 = vunpack.c.h.bf16 %v382_v28  ;;  %v350_v33 = vunpack.c.h.bf16 %v390_v30  ;;  %v317_v35 = vunpack.c.l.bf16 %v382_v28  ;;  %v349_v37 = vunpack.c.l.bf16 %v390_v30  ;;  %v81_v48 = vld [vmem:[%s590_s0] sm:$0xff]  ;;  %v82_v50 = vld [vmem:[%s590_s0 + $0x8] sm:$0xff]  ;;  %v84_v54 = vld [vmem:[%s590_s0 + $0x18] sm:$0xff] }
   0x8   :  { %91 = vmatpush.msra.mxu0 %v334_v8  ;;  %399 = vmatpush.msra.mxu2 %v334_v8  ;;  %v314_v38 = vunpack.c.h.bf16 %v381_v34  ;;  %v346_v39 = vunpack.c.h.bf16 %v389_v36  ;;  %v313_v41 = vunpack.c.l.bf16 %v381_v34  ;;  %v345_v43 = vunpack.c.l.bf16 %v389_v36  ;;  %v85_v49 = vld [vmem:[%s590_s0 + $0x20] sm:$0xff]  ;;  %v86_v51 = vld [vmem:[%s590_s0 + $0x28] sm:$0xff]  ;;  %v88_v55 = vld [vmem:[%s590_s0 + $0x38] sm:$0xff] }
   0x9   :  { %120 = vmatpush.msra.mxu1 %v366_v9  ;;  %415 = vmatpush.msra.mxu3 %v366_v9  ;;  %v310_v44 = vunpack.c.h.bf16 %v308_v40  ;;  %v342_v45 = vunpack.c.h.bf16 %v388_v42  ;;  %v309_v46 = vunpack.c.l.bf16 %v308_v40  ;;  %v341_v47 = vunpack.c.l.bf16 %v388_v42 }
   0xa   :  { %92 = vmatpush.msra.mxu0 %v333_v11  ;;  %400 = vmatpush.msra.mxu2 %v333_v11 }
   0xb   :  { %121 = vmatpush.msra.mxu1 %v365_v13  ;;  %416 = vmatpush.msra.mxu3 %v365_v13 }
   0xc   :  { %93 = vmatpush.msra.mxu0 %v330_v14  ;;  %401 = vmatpush.msra.mxu2 %v330_v14 }
   0xd   :  { %122 = vmatpush.msra.mxu1 %v362_v15  ;;  %417 = vmatpush.msra.mxu3 %v362_v15 }
   0xe   :  { %94 = vmatpush.msra.mxu0 %v329_v17  ;;  %402 = vmatpush.msra.mxu2 %v329_v17 }
   0xf   :  { %123 = vmatpush.msra.mxu1 %v361_v19  ;;  %418 = vmatpush.msra.mxu3 %v361_v19 }
  0x10   :  { %95 = vmatpush.msra.mxu0 %v326_v20  ;;  %403 = vmatpush.msra.mxu2 %v326_v20  ;;  %v441_v20 = vmov 0  }
  0x11   :  { %124 = vmatpush.msra.mxu1 %v358_v21  ;;  %419 = vmatpush.msra.mxu3 %v358_v21 }
  0x12   :  { %96 = vmatpush.msra.mxu0 %v325_v23  ;;  %404 = vmatpush.msra.mxu2 %v325_v23 }
  0x13   :  { %125 = vmatpush.msra.mxu1 %v357_v25  ;;  %420 = vmatpush.msra.mxu3 %v357_v25 }
  0x14   :  { %97 = vmatpush.msra.mxu0 %v322_v26  ;;  %405 = vmatpush.msra.mxu2 %v322_v26 }
  0x15   :  { %126 = vmatpush.msra.mxu1 %v354_v27  ;;  %421 = vmatpush.msra.mxu3 %v354_v27 }
  0x16   :  { %98 = vmatpush.msra.mxu0 %v321_v29  ;;  %406 = vmatpush.msra.mxu2 %v321_v29 }
  0x17   :  { %127 = vmatpush.msra.mxu1 %v353_v31  ;;  %422 = vmatpush.msra.mxu3 %v353_v31 }
  0x18   :  { %99 = vmatpush.msra.mxu0 %v318_v32  ;;  %407 = vmatpush.msra.mxu2 %v318_v32 }
  0x19   :  { %128 = vmatpush.msra.mxu1 %v350_v33  ;;  %423 = vmatpush.msra.mxu3 %v350_v33 }
  0x1a   :  { %100 = vmatpush.msra.mxu0 %v317_v35  ;;  %408 = vmatpush.msra.mxu2 %v317_v35 }
  0x1b   :  { %129 = vmatpush.msra.mxu1 %v349_v37  ;;  %424 = vmatpush.msra.mxu3 %v349_v37 }
  0x1c   :  { %101 = vmatpush.msra.mxu0 %v314_v38  ;;  %409 = vmatpush.msra.mxu2 %v314_v38 }
  0x1d   :  { %130 = vmatpush.msra.mxu1 %v346_v39  ;;  %425 = vmatpush.msra.mxu3 %v346_v39 }
  0x1e   :  { %102 = vmatpush.msra.mxu0 %v313_v41  ;;  %410 = vmatpush.msra.mxu2 %v313_v41 }
  0x1f   :  { %131 = vmatpush.msra.mxu1 %v345_v43  ;;  %426 = vmatpush.msra.mxu3 %v345_v43  ;;  %v179_v43 = vld [vmem:[%s591_s2] sm:$0xff] }
  0x20   :  { %103 = vmatpush.msra.mxu0 %v310_v44  ;;  %411 = vmatpush.msra.mxu2 %v310_v44 }
  0x21   :  { %132 = vmatpush.msra.mxu1 %v342_v45  ;;  %427 = vmatpush.msra.mxu3 %v342_v45 }
  0x22   :  { %104 = vmatpush.msra.mxu0 %v309_v46  ;;  %412 = vmatpush.msra.mxu2 %v309_v46 }
  0x23   :  { %133 = vmatpush.msra.mxu1 %v341_v47  ;;  %428 = vmatpush.msra.mxu3 %v341_v47 }
  0x24   :  { %105 = vmatmul.f32.vlgmr.msra.gmra.mxu0 %v81_v48  ;;  %111 = vmatmul.f32.vlgmr.msra.gmra.mxu2 %v85_v49 }
  0x25   :  { %134 = vmatmul.f32.vlgmr.msra.gmra.mxu1 %v82_v50  ;;  %140 = vmatmul.f32.vlgmr.msra.gmra.mxu3 %v86_v51 }
  0x26   :  { %430 = vset.pattern.permute.xlu2 %v441_v20  ;;  %432 = vset.pattern.permute.xlu1 %v441_v20 }
  0x27   :  { %431 = vset.pattern.permute.xlu0 %v441_v20 }
  0x2c   :  { %108 = vmatmul.f32.gmra.mxu0 %v83_v52  ;;  %114 = vmatmul.f32.gmra.mxu2 %v87_v53 }
  0x2d   :  { %137 = vmatmul.f32.gmra.mxu1 %v84_v54  ;;  %143 = vmatmul.f32.gmra.mxu3 %v88_v55  ;;  %v181_v54 = vld [vmem:[%s591_s2 + $0x10] sm:$0xff] }
  0xa1   :  { %v106_v56 = vpop.f32.mrf.mxu0 }
  0xa2   :  { %v135_v57 = vpop.f32.mrf.mxu1 }
  0xa3   :  { %v136_v58 = vadd.f32 %v135_v57, %v106_v56 }
  0xa5   :  { %147 = vadd.xlane.f32.xlu0 %v136_v58 }
  0xa7   :  { %v112_v59 = vpop.f32.mrf.mxu2 }
  0xa8   :  { %v141_v60 = vpop.f32.mrf.mxu3 }
  0xa9   :  { %v142_v61 = vadd.f32 %v141_v60, %v112_v59  ;;  %v109_v62 = vpop.f32.mrf.mxu0 }
  0xaa   :  { %v138_v63 = vpop.f32.mrf.mxu1 }
  0xab   :  { %v139_v0 = vadd.f32 %v138_v63, %v109_v62  ;;  %151 = vadd.xlane.f32.xlu1 %v142_v61  ;;  %v255_v62 = vld [vmem:[%s592_s3] sm:$0xff] }
  0xad   :  { %149 = vadd.xlane.f32.xlu0 %v139_v0 }
  0xaf   :  { %v115_v1 = vpop.f32.mrf.mxu2 }
  0xb0   :  { %v144_v2 = vpop.f32.mrf.mxu3 }
  0xb1   :  { %v145_v3 = vadd.f32 %v144_v2, %v115_v1 }
  0xb3   :  { %153 = vadd.xlane.f32.xlu1 %v145_v3 }
 0x118   :  { %v148_v4 = vpop.xlane.xlu0 %147 }
 0x119   :  { %v155_v5 = vmul.f32 0.0078125, %v148_v4  ;;  %v182_v4 = vld [vmem:[%s591_s2 + $0x18] sm:$0xff] }
 0x11b   :  { %v539_v6 = vsub.f32 %v136_v58, %v155_v5  ;;  %v180_v58 = vld [vmem:[%s591_s2 + $0x8] sm:$0xff] }
 0x11d   :  { %v163_v7 = vmul.f32 %v539_v6, %v539_v6 }
 0x11e   :  { %v152_v8 = vpop.xlane.xlu1 %151 }
 0x11f   :  { %v157_v9 = vmul.f32 0.0078125, %v152_v8  ;;  %167 = vadd.xlane.f32.xlu2 %v163_v7  ;;  %v258_v8 = vld [vmem:[%s592_s3 + $0x18] sm:$0xff] }
 0x120   :  { %v150_v10 = vpop.xlane.xlu0 %149 }
 0x121   :  { %v543_v11 = vsub.f32 %v142_v61, %v157_v9  ;;  %v156_v12 = vmul.f32 0.0078125, %v150_v10  ;;  %v257_v9 = vld [vmem:[%s592_s3 + $0x10] sm:$0xff] }
 0x123   :  { %v545_v13 = vsub.f32 %v139_v0, %v156_v12  ;;  %v165_v14 = vmul.f32 %v543_v11, %v543_v11 }
 0x125   :  { %171 = vadd.xlane.f32.xlu0 %v165_v14  ;;  %v164_v15 = vmul.f32 %v545_v13, %v545_v13 }
 0x126   :  { %v154_v16 = vpop.xlane.xlu1 %153 }
 0x127   :  { %v158_v17 = vmul.f32 0.0078125, %v154_v16  ;;  %169 = vadd.xlane.f32.xlu2 %v164_v15 }
 0x129   :  { %v551_v18 = vsub.f32 %v145_v3, %v158_v17  ;;  %v256_v3 = vld [vmem:[%s592_s3 + $0x8] sm:$0xff] }
 0x12b   :  { %v166_v19 = vmul.f32 %v551_v18, %v551_v18 }
 0x12d   :  { %173 = vadd.xlane.f32.xlu1 %v166_v19 }
 0x192   :  { %v168_v21 = vpop.xlane.xlu2 %167 }
 0x193   :  { %v175_v22 = vmul.f32 0.0078125, %v168_v21 }
 0x195   :  { %v183_v23 = vadd.f32 1e-05, %v175_v22 }
 0x197   :  { %433 = vrsqrt.f32 %v183_v23  ;;  %vm193_vm1 = vweird.f32 %v183_v23 }
 0x198   :  { %v172_v24 = vpop.xlane.xlu0 %171 }
 0x199   :  { %v177_v25 = vmul.f32 0.0078125, %v172_v24 }
 0x19a   :  { %v170_v26 = vpop.xlane.xlu2 %169 }
 0x19b   :  { %v185_v27 = vadd.f32 1e-05, %v177_v25  ;;  %v176_v28 = vmul.f32 0.0078125, %v170_v26 }
 0x19d   :  { %v434_v29 = vpop.eup %433  ;;  %435 = vrsqrt.f32 %v185_v27  ;;  %v184_v30 = vadd.f32 1e-05, %v176_v28  ;;  %vm213_vm4 = vweird.f32 %v185_v27 }
 0x19e   :  { %v188_v31 = vmul.f32 %v434_v29, %v183_v23  ;;  %vm194_vm0 = vweird.f32 %v434_v29 }
 0x19f   :  { %437 = vrsqrt.f32 %v184_v30  ;;  %vm195_vm2 = vmor %vm193_vm1, %vm194_vm0  ;;  %vm203_vm7 = vweird.f32 %v184_v30 }
 0x1a0   :  { %v189_v32 = vmul.f32 %v434_v29, %v188_v31  ;;  %v174_v33 = vpop.xlane.xlu1 %173 }
 0x1a1   :  { %v178_v34 = vmul.f32 0.0078125, %v174_v33 }
 0x1a2   :  { %v190_v35 = vmul.f32 0.5, %v189_v32 }
 0x1a3   :  { %v436_v36 = vpop.eup %435  ;;  %v186_v37 = vadd.f32 1e-05, %v178_v34 }
 0x1a4   :  { %v191_v38 = vsub.f32 1.5, %v190_v35  ;;  %v208_v39 = vmul.f32 %v436_v36, %v185_v27  ;;  %vm214_vm3 = vweird.f32 %v436_v36 }
 0x1a5   :  { %v438_v40 = vpop.eup %437  ;;  %439 = vrsqrt.f32 %v186_v37  ;;  %vm215_vm6 = vmor %vm213_vm4, %vm214_vm3  ;;  %vm223_vm10 = vweird.f32 %v186_v37 }
 0x1a6   :  { %v209_v41 = vmul.f32 %v436_v36, %v208_v39  ;;  %v198_v42 = vmul.f32 %v438_v40, %v184_v30  ;;  %v192_v44 = vmul.f32 %v434_v29, %v191_v38  ;;  %vm204_vm5 = vweird.f32 %v438_v40 }
 0x1a7   :  { %vm205_vm8 = vmor %vm203_vm7, %vm204_vm5 }
 0x1a8   :  { %v210_v45 = vmul.f32 0.5, %v209_v41  ;;  %v199_v46 = vmul.f32 %v438_v40, %v198_v42  ;;  %v196_v47 = vsel %vm195_vm2, %v434_v29, %v192_v44 }
 0x1a9   :  { %v227_v48 = vmul.f32 %v196_v47, %v179_v43 }
 0x1aa   :  { %v211_v49 = vsub.f32 1.5, %v210_v45  ;;  %v200_v50 = vmul.f32 0.5, %v199_v46 }
 0x1ab   :  { %v440_v51 = vpop.eup %439  ;;  %233 = vperm.xlu2 %430, %v227_v48  }
 0x1ac   :  { %v201_v52 = vsub.f32 1.5, %v200_v50  ;;  %v218_v53 = vmul.f32 %v440_v51, %v186_v37  ;;  %v212_v55 = vmul.f32 %v436_v36, %v211_v49  ;;  %vm224_vm9 = vweird.f32 %v440_v51 }
 0x1ad   :  { %vm225_vm11 = vmor %vm223_vm10, %vm224_vm9 }
 0x1ae   :  { %v219_v56 = vmul.f32 %v440_v51, %v218_v53  ;;  %v216_v57 = vsel %vm215_vm6, %v436_v36, %v212_v55  ;;  %v202_v59 = vmul.f32 %v438_v40, %v201_v52 }
 0x1af   :  { %v229_v60 = vmul.f32 %v216_v57, %v181_v54 }
 0x1b0   :  { %v220_v61 = vmul.f32 0.5, %v219_v56  ;;  %v206_v63 = vsel %vm205_vm8, %v438_v40, %v202_v59 }
 0x1b1   :  { %243 = vperm.xlu1 %432, %v229_v60   ;;  %v228_v0 = vmul.f32 %v206_v63, %v180_v58 }
 0x1b2   :  { %v221_v1 = vsub.f32 1.5, %v220_v61 }
 0x1b3   :  { %261 = vperm.xlu2 %430, %v255_v62   ;;  %238 = vperm.xlu0 %431, %v228_v0  }
 0x1b4   :  { %v222_v2 = vmul.f32 %v440_v51, %v221_v1 }
 0x1b6   :  { %v226_v5 = vsel %vm225_vm11, %v440_v51, %v222_v2 }
 0x1b7   :  { %v230_v7 = vmul.f32 %v226_v5, %v182_v4 }
 0x1b9   :  { %266 = vperm.xlu1 %432, %v256_v3  }
 0x1bb   :  { %248 = vperm.xlu2 %430, %v230_v7  }
 0x1c1   :  { %276 = vperm.xlu1 %432, %v258_v8  }
 0x1c3   :  { %271 = vperm.xlu2 %430, %v257_v9  }
 0x205   :  { %v234_v10 = vpop.permute.xlu2 %233 }
 0x206   :  { %v251_v16 = vmul.f32 %v234_v10, %v539_v6 }
 0x20d   :  { %v262_v12 = vpop.permute.xlu2 %261 }
 0x20e   :  { %v279_v19 = vadd.f32 %v262_v12, %v251_v16 }
 0x210   :  { %v287_v22 = vmul.f32 0.2, %v279_v19  ;;  %vm283_vm12 = vcmp.ge.f32.partialorder %v279_v19, 0.0 }
 0x212   :  { %v291_v27 = vsel %vm283_vm12, %v279_v19, %v287_v22 }
 0x215   :  { %v249_v15 = vpop.permute.xlu2 %248 }
 0x216   :  { %v254_v31 = vmul.f32 %v249_v15, %v551_v18 }
 0x21d   :  { %v272_v26 = vpop.permute.xlu2 %271 }
 0x223   :  { %v244_v14 = vpop.permute.xlu1 %243 }
 0x224   :  { %v253_v23 = vmul.f32 %v244_v14, %v543_v11 }
 0x225   :  { %v239_v17 = vpop.permute.xlu0 %238 }
 0x226   :  { %v252_v20 = vmul.f32 %v239_v17, %v545_v13  ;;  %v281_v28 = vadd.f32 %v272_v26, %v253_v23 }
 0x228   :  { %v289_v13 = vmul.f32 0.2, %v281_v28  ;;  %vm285_vm14 = vcmp.ge.f32.partialorder %v281_v28, 0.0 }
 0x22a   :  { %v293_v33 = vsel %vm285_vm14, %v281_v28, %v289_v13 }
 0x22b   :  { %v267_v21 = vpop.permute.xlu1 %266 }
 0x22c   :  { %v280_v24 = vadd.f32 %v267_v21, %v252_v20 }
 0x22e   :  { %vm284_vm13 = vcmp.ge.f32.partialorder %v280_v24, 0.0  ;;  %v288_v25 = vmul.f32 0.2, %v280_v24 }
 0x230   :  { %v292_v29 = vsel %vm284_vm13, %v280_v24, %v288_v25 }
 0x231   :  { %v374_v30 = vpack.c.bf16 %v292_v29, %v291_v27 }
 0x233   :  { %375 = vst [vmem:[%s593_s4] sm:$0xff] %v374_v30   ;;  %v277_v6 = vpop.permute.xlu1 %276 }
 0x234   :  { %v282_v32 = vadd.f32 %v277_v6, %v254_v31 }
 0x236   :  { %vm286_vm15 = vcmp.ge.f32.partialorder %v282_v32, 0.0  ;;  %v290_v11 = vmul.f32 0.2, %v282_v32 }
 0x238   :  { %v294_v34 = vsel %vm286_vm15, %v282_v32, %v290_v11 }
 0x239   :  { %v379_v35 = vpack.c.bf16 %v294_v34, %v293_v33 }
 0x23b   :  { %396 = vst [vmem:[%s593_s4 + $0x8] sm:$0xff] %v379_v35  }

// kernel: discriminator_forward.7
= control target key start
LH: loop header
LB: loop body
LE: loop exit
PB: predicated region body
PF: predicated region fallthrough
CT: control target
= control target key end

     0   :  { %vm224_vm0 = vcmask 523264   ;;  %vm331_vm11 = vcmask 261120   ;;  %s667_s1 = inlined_call_operand.vmem [shape: f32[512,64], index: 1, kind: input, shape index: {}]   ;;  %s668_s0 = inlined_call_operand.vmem [shape: bf16[32,512], index: 0, kind: input, shape index: {}]   ;;  %s669_s3 = inlined_call_operand.vmem [shape: f32[1,64], index: 3, kind: input, shape index: {}]   ;;  %s670_s2 = inlined_call_operand.vmem [shape: f32[1,64], index: 2, kind: input, shape index: {}]   ;;  %s671_s4 = inlined_call_operand.vmem [shape: f32[16,64], index: 4, kind: input, shape index: {}]   ;;  %s672_s5 = inlined_call_operand.vmem [shape: f32[2,1], index: 5, kind: output, shape index: {}]  }
   0x1   :  { %v91_v0 = vld [vmem:[%s667_s1 + $0x178] sm:$0xff]  ;;  %v90_v1 = vld [vmem:[%s667_s1 + $0x170] sm:$0xff]  ;;  %v89_v5 = vld [vmem:[%s667_s1 + $0x168] sm:$0xff] }
   0x2   :  { %v107_v2 = vld [vmem:[%s667_s1 + $0x1f8] sm:$0xff]  ;;  %166 = vmatpush.msra.mxu2 %v91_v0  ;;  %v106_v6 = vld [vmem:[%s667_s1 + $0x1f0] sm:$0xff]  ;;  %v105_v9 = vld [vmem:[%s667_s1 + $0x1e8] sm:$0xff] }
   0x3   :  { %195 = vmatpush.msra.mxu3 %v107_v2  ;;  %v59_v3 = vld [vmem:[%s667_s1 + $0x78] sm:$0xff]  ;;  %v58_v7 = vld [vmem:[%s667_s1 + $0x70] sm:$0xff]  ;;  %v57_v10 = vld [vmem:[%s667_s1 + $0x68] sm:$0xff] }
   0x4   :  { %v75_v4 = vld [vmem:[%s667_s1 + $0xf8] sm:$0xff]  ;;  %108 = vmatpush.msra.mxu0 %v59_v3  ;;  %v74_v8 = vld [vmem:[%s667_s1 + $0xf0] sm:$0xff]  ;;  %167 = vmatpush.msra.mxu2 %v90_v1  ;;  %v88_v11 = vld [vmem:[%s667_s1 + $0x160] sm:$0xff] }
   0x5   :  { %137 = vmatpush.msra.mxu1 %v75_v4  ;;  %196 = vmatpush.msra.mxu3 %v106_v6  ;;  %v73_v12 = vld [vmem:[%s667_s1 + $0xe8] sm:$0xff]  ;;  %v104_v13 = vld [vmem:[%s667_s1 + $0x1e0] sm:$0xff]  ;;  %v87_v16 = vld [vmem:[%s667_s1 + $0x158] sm:$0xff] }
   0x6   :  { %109 = vmatpush.msra.mxu0 %v58_v7  ;;  %168 = vmatpush.msra.mxu2 %v89_v5  ;;  %v56_v14 = vld [vmem:[%s667_s1 + $0x60] sm:$0xff]  ;;  %v103_v17 = vld [vmem:[%s667_s1 + $0x1d8] sm:$0xff]  ;;  %v86_v20 = vld [vmem:[%s667_s1 + $0x150] sm:$0xff] }
   0x7   :  { %138 = vmatpush.msra.mxu1 %v74_v8  ;;  %197 = vmatpush.msra.mxu3 %v105_v9  ;;  %v72_v15 = vld [vmem:[%s667_s1 + $0xe0] sm:$0xff]  ;;  %v55_v18 = vld [vmem:[%s667_s1 + $0x58] sm:$0xff]  ;;  %v102_v21 = vld [vmem:[%s667_s1 + $0x1d0] sm:$0xff] }
   0x8   :  { %110 = vmatpush.msra.mxu0 %v57_v10  ;;  %169 = vmatpush.msra.mxu2 %v88_v11  ;;  %v71_v19 = vld [vmem:[%s667_s1 + $0xd8] sm:$0xff]  ;;  %v54_v22 = vld [vmem:[%s667_s1 + $0x50] sm:$0xff]  ;;  %v85_v24 = vld [vmem:[%s667_s1 + $0x148] sm:$0xff] }
   0x9   :  { %139 = vmatpush.msra.mxu1 %v73_v12  ;;  %198 = vmatpush.msra.mxu3 %v104_v13  ;;  %v70_v23 = vld [vmem:[%s667_s1 + $0xd0] sm:$0xff]  ;;  %v101_v25 = vld [vmem:[%s667_s1 + $0x1c8] sm:$0xff]  ;;  %v84_v28 = vld [vmem:[%s667_s1 + $0x140] sm:$0xff] }
   0xa   :  { %111 = vmatpush.msra.mxu0 %v56_v14  ;;  %170 = vmatpush.msra.mxu2 %v87_v16  ;;  %v53_v26 = vld [vmem:[%s667_s1 + $0x48] sm:$0xff]  ;;  %v100_v29 = vld [vmem:[%s667_s1 + $0x1c0] sm:$0xff]  ;;  %v83_v32 = vld [vmem:[%s667_s1 + $0x138] sm:$0xff] }
   0xb   :  { %140 = vmatpush.msra.mxu1 %v72_v15  ;;  %199 = vmatpush.msra.mxu3 %v103_v17  ;;  %v69_v27 = vld [vmem:[%s667_s1 + $0xc8] sm:$0xff]  ;;  %v52_v30 = vld [vmem:[%s667_s1 + $0x40] sm:$0xff]  ;;  %v99_v33 = vld [vmem:[%s667_s1 + $0x1b8] sm:$0xff] }
   0xc   :  { %112 = vmatpush.msra.mxu0 %v55_v18  ;;  %171 = vmatpush.msra.mxu2 %v86_v20  ;;  %v68_v31 = vld [vmem:[%s667_s1 + $0xc0] sm:$0xff]  ;;  %v51_v34 = vld [vmem:[%s667_s1 + $0x38] sm:$0xff]  ;;  %v82_v36 = vld [vmem:[%s667_s1 + $0x130] sm:$0xff] }
   0xd   :  { %141 = vmatpush.msra.mxu1 %v71_v19  ;;  %200 = vmatpush.msra.mxu3 %v102_v21  ;;  %v67_v35 = vld [vmem:[%s667_s1 + $0xb8] sm:$0xff]  ;;  %v98_v37 = vld [vmem:[%s667_s1 + $0x1b0] sm:$0xff]  ;;  %v81_v40 = vld [vmem:[%s667_s1 + $0x128] sm:$0xff] }
   0xe   :  { %113 = vmatpush.msra.mxu0 %v54_v22  ;;  %172 = vmatpush.msra.mxu2 %v85_v24  ;;  %v50_v38 = vld [vmem:[%s667_s1 + $0x30] sm:$0xff]  ;;  %v97_v41 = vld [vmem:[%s667_s1 + $0x1a8] sm:$0xff]  ;;  %v80_v44 = vld [vmem:[%s667_s1 + $0x120] sm:$0xff] }
   0xf   :  { %142 = vmatpush.msra.mxu1 %v70_v23  ;;  %201 = vmatpush.msra.mxu3 %v101_v25  ;;  %v66_v39 = vld [vmem:[%s667_s1 + $0xb0] sm:$0xff]  ;;  %v49_v42 = vld [vmem:[%s667_s1 + $0x28] sm:$0xff]  ;;  %v96_v45 = vld [vmem:[%s667_s1 + $0x1a0] sm:$0xff] }
  0x10   :  { %114 = vmatpush.msra.mxu0 %v53_v26  ;;  %173 = vmatpush.msra.mxu2 %v84_v28  ;;  %v65_v43 = vld [vmem:[%s667_s1 + $0xa8] sm:$0xff]  ;;  %v48_v46 = vld [vmem:[%s667_s1 + $0x20] sm:$0xff]  ;;  %v79_v48 = vld [vmem:[%s667_s1 + $0x118] sm:$0xff] }
  0x11   :  { %143 = vmatpush.msra.mxu1 %v69_v27  ;;  %202 = vmatpush.msra.mxu3 %v100_v29  ;;  %v64_v47 = vld [vmem:[%s667_s1 + $0xa0] sm:$0xff]  ;;  %v95_v49 = vld [vmem:[%s667_s1 + $0x198] sm:$0xff]  ;;  %v78_v52 = vld [vmem:[%s667_s1 + $0x110] sm:$0xff] }
  0x12   :  { %115 = vmatpush.msra.mxu0 %v52_v30  ;;  %174 = vmatpush.msra.mxu2 %v83_v32  ;;  %v47_v50 = vld [vmem:[%s667_s1 + $0x18] sm:$0xff]  ;;  %v94_v53 = vld [vmem:[%s667_s1 + $0x190] sm:$0xff]  ;;  %v21_v56 = vld [vmem:[%s668_s0 + $0x8] sm:$0xff] }
  0x13   :  { %144 = vmatpush.msra.mxu1 %v68_v31  ;;  %203 = vmatpush.msra.mxu3 %v99_v33  ;;  %v63_v51 = vld [vmem:[%s667_s1 + $0x98] sm:$0xff]  ;;  %v46_v54 = vld [vmem:[%s667_s1 + $0x10] sm:$0xff]  ;;  %v77_v57 = vld [vmem:[%s667_s1 + $0x108] sm:$0xff]  ;;  %v30_v63 = vunpack.c.l.bf16 %v21_v56  ;;  %v31_v1 = vunpack.c.h.bf16 %v21_v56 }
  0x14   :  { %116 = vmatpush.msra.mxu0 %v51_v34  ;;  %175 = vmatpush.msra.mxu2 %v82_v36  ;;  %v62_v55 = vld [vmem:[%s667_s1 + $0x90] sm:$0xff]  ;;  %v93_v58 = vld [vmem:[%s667_s1 + $0x188] sm:$0xff]  ;;  %v20_v61 = vld [vmem:[%s668_s0] sm:$0xff] }
  0x15   :  { %145 = vmatpush.msra.mxu1 %v67_v35  ;;  %204 = vmatpush.msra.mxu3 %v98_v37  ;;  %v45_v59 = vld [vmem:[%s667_s1 + $0x8] sm:$0xff]  ;;  %v76_v62 = vld [vmem:[%s667_s1 + $0x100] sm:$0xff]  ;;  %v28_v4 = vunpack.c.l.bf16 %v20_v61  ;;  %v29_v5 = vunpack.c.h.bf16 %v20_v61  ;;  %v23_v6 = vld [vmem:[%s668_s0 + $0x18] sm:$0xff] }
  0x16   :  { %117 = vmatpush.msra.mxu0 %v50_v38  ;;  %176 = vmatpush.msra.mxu2 %v81_v40  ;;  %v61_v60 = vld [vmem:[%s667_s1 + $0x88] sm:$0xff]  ;;  %v92_v0 = vld [vmem:[%s667_s1 + $0x180] sm:$0xff]  ;;  %v22_v7 = vld [vmem:[%s668_s0 + $0x10] sm:$0xff]  ;;  %v34_v8 = vunpack.c.l.bf16 %v23_v6  ;;  %v35_v9 = vunpack.c.h.bf16 %v23_v6 }
  0x17   :  { %146 = vmatpush.msra.mxu1 %v66_v39  ;;  %205 = vmatpush.msra.mxu3 %v97_v41  ;;  %v44_v2 = vld [vmem:[%s667_s1] sm:$0xff]  ;;  %v32_v10 = vunpack.c.l.bf16 %v22_v7  ;;  %v33_v11 = vunpack.c.h.bf16 %v22_v7  ;;  %v25_v12 = vld [vmem:[%s668_s0 + $0x28] sm:$0xff]  ;;  %v27_v18 = vld [vmem:[%s668_s0 + $0x38] sm:$0xff] }
  0x18   :  { %118 = vmatpush.msra.mxu0 %v49_v42  ;;  %177 = vmatpush.msra.mxu2 %v80_v44  ;;  %v60_v3 = vld [vmem:[%s667_s1 + $0x80] sm:$0xff]  ;;  %v38_v14 = vunpack.c.l.bf16 %v25_v12  ;;  %v39_v15 = vunpack.c.h.bf16 %v25_v12  ;;  %v26_v19 = vld [vmem:[%s668_s0 + $0x30] sm:$0xff]  ;;  %v42_v20 = vunpack.c.l.bf16 %v27_v18  ;;  %v43_v21 = vunpack.c.h.bf16 %v27_v18 }
  0x19   :  { %147 = vmatpush.msra.mxu1 %v65_v43  ;;  %206 = vmatpush.msra.mxu3 %v96_v45  ;;  %v24_v13 = vld [vmem:[%s668_s0 + $0x20] sm:$0xff]  ;;  %v40_v22 = vunpack.c.l.bf16 %v26_v19  ;;  %v41_v23 = vunpack.c.h.bf16 %v26_v19 }
  0x1a   :  { %119 = vmatpush.msra.mxu0 %v48_v46  ;;  %178 = vmatpush.msra.mxu2 %v79_v48  ;;  %v36_v16 = vunpack.c.l.bf16 %v24_v13  ;;  %v37_v17 = vunpack.c.h.bf16 %v24_v13 }
  0x1b   :  { %148 = vmatpush.msra.mxu1 %v64_v47  ;;  %207 = vmatpush.msra.mxu3 %v95_v49 }
  0x1c   :  { %120 = vmatpush.msra.mxu0 %v47_v50  ;;  %179 = vmatpush.msra.mxu2 %v78_v52 }
  0x1d   :  { %149 = vmatpush.msra.mxu1 %v63_v51  ;;  %208 = vmatpush.msra.mxu3 %v94_v53 }
  0x1e   :  { %121 = vmatpush.msra.mxu0 %v46_v54  ;;  %180 = vmatpush.msra.mxu2 %v77_v57 }
  0x1f   :  { %150 = vmatpush.msra.mxu1 %v62_v55  ;;  %209 = vmatpush.msra.mxu3 %v93_v58 }
  0x20   :  { %122 = vmatpush.msra.mxu0 %v45_v59  ;;  %181 = vmatpush.msra.mxu2 %v76_v62 }
  0x21   :  { %151 = vmatpush.msra.mxu1 %v61_v60  ;;  %210 = vmatpush.msra.mxu3 %v92_v0 }
  0x22   :  { %182 = vmatmul.f32.vlgmr.msra.gmra.mxu2 %v30_v63  ;;  %211 = vmatmul.f32.vlgmr.msra.gmra.mxu3 %v31_v1 }
  0x23   :  { %123 = vmatpush.msra.mxu0 %v44_v2  ;;  %152 = vmatpush.msra.mxu1 %v60_v3 }
  0x24   :  { %124 = vmatmul.f32.vlgmr.msra.gmra.mxu0 %v28_v4  ;;  %153 = vmatmul.f32.vlgmr.msra.gmra.mxu1 %v29_v5 }
  0x2a   :  { %185 = vmatmul.f32.gmra.mxu2 %v34_v8  ;;  %214 = vmatmul.f32.gmra.mxu3 %v35_v9 }
  0x2c   :  { %127 = vmatmul.f32.gmra.mxu0 %v32_v10  ;;  %156 = vmatmul.f32.gmra.mxu1 %v33_v11 }
  0x32   :  { %188 = vmatmul.f32.gmra.mxu2 %v38_v14  ;;  %217 = vmatmul.f32.gmra.mxu3 %v39_v15 }
  0x34   :  { %130 = vmatmul.f32.gmra.mxu0 %v36_v16  ;;  %159 = vmatmul.f32.gmra.mxu1 %v37_v17 }
  0x3a   :  { %191 = vmatmul.f32.gmra.mxu2 %v42_v20  ;;  %220 = vmatmul.f32.gmra.mxu3 %v43_v21 }
  0x3c   :  { %133 = vmatmul.f32.gmra.mxu0 %v40_v22  ;;  %162 = vmatmul.f32.gmra.mxu1 %v41_v23 }
  0xa1   :  { %v125_v24 = vpop.f32.mrf.mxu0  ;;  %v154_v25 = vpop.f32.mrf.mxu1 }
  0xa2   :  { %v155_v35 = vadd.f32 %v154_v25, %v125_v24 }
  0xa5   :  { %v183_v26 = vpop.f32.mrf.mxu2  ;;  %v212_v27 = vpop.f32.mrf.mxu3 }
  0xa6   :  { %v184_v40 = vadd.f32 %v183_v26, %v155_v35  ;;  %v386_v35 = vld [vmem:[%s669_s3] ss:$0 sm:$0xff] }
  0xa8   :  { %v213_v45 = vadd.f32 %v212_v27, %v184_v40 }
  0xa9   :  { %v128_v28 = vpop.f32.mrf.mxu0  ;;  %v157_v29 = vpop.f32.mrf.mxu1 }
  0xaa   :  { %v158_v32 = vadd.f32 %v157_v29, %v128_v28  ;;  %v225_v51 = vsel %vm224_vm0, %v213_v45, 0.0 }
  0xad   :  { %v186_v30 = vpop.f32.mrf.mxu2  ;;  %v215_v31 = vpop.f32.mrf.mxu3 }
  0xae   :  { %v187_v37 = vadd.f32 %v186_v30, %v158_v32  ;;  %v261_v30 = vld [vmem:[%s670_s2] sm:$0x1] }
  0xb0   :  { %v216_v42 = vadd.f32 %v215_v31, %v187_v37 }
  0xb1   :  { %v131_v33 = vpop.f32.mrf.mxu0  ;;  %v160_v34 = vpop.f32.mrf.mxu1 }
  0xb2   :  { %v161_v36 = vadd.f32 %v160_v34, %v131_v33  ;;  %v226_v48 = vsel %vm224_vm0, %v216_v42, 0.0 }
  0xb3   :  { %v227_v54 = vadd.f32 %v226_v48, %v225_v51 }
  0xb5   :  { %v189_v38 = vpop.f32.mrf.mxu2  ;;  %v218_v39 = vpop.f32.mrf.mxu3 }
  0xb6   :  { %v190_v41 = vadd.f32 %v189_v38, %v161_v36 }
  0xb8   :  { %v219_v46 = vadd.f32 %v218_v39, %v190_v41 }
  0xb9   :  { %v134_v43 = vpop.f32.mrf.mxu0  ;;  %v163_v44 = vpop.f32.mrf.mxu1 }
  0xba   :  { %v164_v47 = vadd.f32 %v163_v44, %v134_v43  ;;  %v228_v52 = vsel %vm224_vm0, %v219_v46, 0.0  ;;  %v302_v44 = vld [vmem:[%s671_s4 + $0x8] sm:$0xff] }
  0xbb   :  { %v229_v56 = vadd.f32 %v228_v52, %v227_v54 }
  0xbd   :  { %v192_v49 = vpop.f32.mrf.mxu2  ;;  %v221_v50 = vpop.f32.mrf.mxu3 }
  0xbe   :  { %v193_v53 = vadd.f32 %v192_v49, %v164_v47 }
  0xc0   :  { %v222_v55 = vadd.f32 %v221_v50, %v193_v53 }
  0xc2   :  { %v230_v57 = vsel %vm224_vm0, %v222_v55, 0.0 }
  0xc3   :  { %v231_v58 = vadd.f32 %v230_v57, %v229_v56  ;;  %v301_v56 = vld [vmem:[%s671_s4] sm:$0xff] }
  0xc5   :  { %v232_v59 = vrot.slane %v231_v58, 4 }
  0xc7   :  { %v233_v60 = vadd.f32 %v232_v59, %v231_v58 }
  0xc9   :  { %v234_v61 = vrot.slane %v233_v60, 2 }
  0xcb   :  { %v235_v62 = vadd.f32 %v234_v61, %v233_v60 }
  0xcd   :  { %v236_v63 = vrot.slane %v235_v62, 1 }
  0xcf   :  { %v237_v0 = vadd.f32 %v236_v63, %v235_v62  ;;  %v319_v62 = vlaneseq }
  0xd1   :  { %v238_v1 = vmul.f32 0.03125, %v237_v0  ;;  %v320_v63 = vshrl.u32 %v319_v62, 7 }
  0xd3   :  { %v239_v2 = vsub.f32 %v213_v45, %v238_v1  ;;  %v240_v3 = vsub.f32 %v216_v42, %v238_v1  ;;  %v241_v4 = vsub.f32 %v219_v46, %v238_v1  ;;  %v242_v5 = vsub.f32 %v222_v55, %v238_v1 }
  0xd4   :  { %v325_v0 = vadd.s32 1, %v320_v63 }
  0xd5   :  { %v243_v6 = vmul.f32 %v239_v2, %v239_v2  ;;  %v244_v7 = vmul.f32 %v240_v3, %v240_v3  ;;  %v245_v8 = vmul.f32 %v241_v4, %v241_v4  ;;  %v246_v9 = vmul.f32 %v242_v5, %v242_v5 }
  0xd7   :  { %v247_v10 = vsel %vm224_vm0, %v243_v6, 0.0  ;;  %v248_v11 = vsel %vm224_vm0, %v244_v7, 0.0  ;;  %v250_v13 = vsel %vm224_vm0, %v245_v8, 0.0  ;;  %v252_v15 = vsel %vm224_vm0, %v246_v9, 0.0 }
  0xd8   :  { %v249_v12 = vadd.f32 %v248_v11, %v247_v10  ;;  %v393_v7 = vmov 0.0  }
  0xda   :  { %v251_v14 = vadd.f32 %v250_v13, %v249_v12 }
  0xdc   :  { %v253_v16 = vadd.f32 %v252_v15, %v251_v14 }
  0xde   :  { %v254_v17 = vrot.slane %v253_v16, 4 }
  0xe0   :  { %v255_v18 = vadd.f32 %v254_v17, %v253_v16 }
  0xe2   :  { %v256_v19 = vrot.slane %v255_v18, 2 }
  0xe4   :  { %v257_v20 = vadd.f32 %v256_v19, %v255_v18 }
  0xe6   :  { %v258_v21 = vrot.slane %v257_v20, 1 }
  0xe8   :  { %v259_v22 = vadd.f32 %v258_v21, %v257_v20 }
  0xea   :  { %v260_v23 = vmul.f32 0.03125, %v259_v22 }
  0xec   :  { %v262_v24 = vadd.f32 1e-05, %v260_v23 }
  0xee   :  { %387 = vrsqrt.f32 %v262_v24  ;;  %vm269_vm2 = vweird.f32 %v262_v24 }
  0xf4   :  { %v388_v25 = vpop.eup %387 }
  0xf5   :  { %v264_v26 = vmul.f32 %v388_v25, %v262_v24  ;;  %vm270_vm1 = vweird.f32 %v388_v25 }
  0xf6   :  { %vm271_vm3 = vmor %vm269_vm2, %vm270_vm1  ;;  %vm377_vm1 = vcmask 1024  }
  0xf7   :  { %v265_v27 = vmul.f32 %v388_v25, %v264_v26 }
  0xf9   :  { %v266_v28 = vmul.f32 0.5, %v265_v27 }
  0xfb   :  { %v267_v29 = vsub.f32 1.5, %v266_v28 }
  0xfd   :  { %v268_v31 = vmul.f32 %v388_v25, %v267_v29 }
  0xff   :  { %v272_v32 = vsel %vm271_vm3, %v388_v25, %v268_v31 }
 0x100   :  { %v273_v33 = vmul.f32 %v272_v32, %v261_v30 }
 0x102   :  { %v275_v34 = vperm.slane %v273_v33, 0 }
 0x104   :  { %v280_v36 = vmul.f32 %v275_v34, %v242_v5  ;;  %v278_v37 = vmul.f32 %v275_v34, %v240_v3  ;;  %v279_v38 = vmul.f32 %v275_v34, %v241_v4  ;;  %v277_v39 = vmul.f32 %v275_v34, %v239_v2 }
 0x105   :  { %v322_v2 = vand.u32 127, %v319_v62  ;;  %v323_v3 = vmul.u32 16, %v320_v63  ;;  %v326_v4 = vmul.u32 16, %v325_v0 }
 0x106   :  { %v288_v40 = vadd.f32 %v386_v35, %v280_v36  ;;  %v286_v41 = vadd.f32 %v386_v35, %v278_v37  ;;  %v287_v42 = vadd.f32 %v386_v35, %v279_v38  ;;  %v285_v43 = vadd.f32 %v386_v35, %v277_v39 }
 0x107   :  { %vm324_vm8 = vcmp.ge.s32.totalorder %v322_v2, %v323_v3  ;;  %vm327_vm9 = vcmp.lt.s32.totalorder %v322_v2, %v326_v4 }
 0x108   :  { %vm292_vm4 = vcmp.ge.f32.partialorder %v288_v40, 0.0  ;;  %v296_v45 = vmul.f32 0.2, %v288_v40  ;;  %vm290_vm5 = vcmp.ge.f32.partialorder %v286_v41, 0.0  ;;  %v294_v46 = vmul.f32 0.2, %v286_v41  ;;  %vm328_vm10 = vmand %vm324_vm8, %vm327_vm9 }
 0x109   :  { %v295_v49 = vmul.f32 0.2, %v287_v42  ;;  %v293_v50 = vmul.f32 0.2, %v285_v43  ;;  %vm291_vm6 = vcmp.ge.f32.partialorder %v287_v42, 0.0  ;;  %vm289_vm7 = vcmp.ge.f32.partialorder %v285_v43, 0.0 }
 0x10a   :  { %v300_v47 = vsel %vm292_vm4, %v288_v40, %v296_v45  ;;  %v298_v48 = vsel %vm290_vm5, %v286_v41, %v294_v46  ;;  %v383_v8 = vsel %vm328_vm10, 1.0, %v393_v7 }
 0x10b   :  { %v306_v51 = vmul.f32 %v302_v44, %v300_v47  ;;  %v304_v52 = vmul.f32 %v302_v44, %v298_v48  ;;  %v299_v55 = vsel %vm291_vm6, %v287_v42, %v295_v49  ;;  %v297_v57 = vsel %vm289_vm7, %v285_v43, %v293_v50 }
 0x10c   :  { %v305_v58 = vmul.f32 %v301_v56, %v299_v55  ;;  %v303_v59 = vmul.f32 %v301_v56, %v297_v57 }
 0x10d   :  { %v316_v53 = vsel %vm224_vm0, %v306_v51, 0.0  ;;  %v310_v54 = vsel %vm224_vm0, %v304_v52, 0.0 }
 0x10e   :  { %317 = vadd.xlane.f32.xlu0 %v316_v53  ;;  %311 = vadd.xlane.f32.xlu1 %v310_v54  ;;  %v313_v60 = vsel %vm224_vm0, %v305_v58, 0.0  ;;  %v307_v61 = vsel %vm224_vm0, %v303_v59, 0.0 }
 0x116   :  { %314 = vadd.xlane.f32.xlu0 %v313_v60  ;;  %308 = vadd.xlane.f32.xlu1 %v307_v61 }
 0x181   :  { %v318_v1 = vpop.xlane.xlu0 %317  ;;  %v312_v5 = vpop.xlane.xlu1 %311 }
 0x182   :  { %347 = vmatpush.msrb.mxu0 %v318_v1 }
 0x189   :  { %v315_v6 = vpop.xlane.xlu0 %314  ;;  %v309_v9 = vpop.xlane.xlu1 %308 }
 0x18a   :  { %348 = vmatpush.msrb.mxu0 %v315_v6 }
 0x18c   :  { %349 = vmatpush.msrb.mxu0 %v312_v5 }
 0x18e   :  { %350 = vmatpush.msrb.mxu0 %v309_v9 }
 0x18f   :  { %384 = vmatmul.msk.f32.vlgmr.msrb.gmra.mxu0 %vm331_vm11, %v383_v8 }
 0x20c   :  { %v352_v10 = vpop.f32.mrf.mxu0 }
 0x20d   :  { %v355_v11 = vand.u32 2147483647, %v352_v10  ;;  %vm359_vm15 = vcmp.ge.f32.partialorder %v352_v10, 0.0 }
 0x20f   :  { %v356_v12 = vsub.f32 0.0, %v355_v11 }
 0x211   :  { %v357_v13 = vmul.f32 1.442695, %v356_v12 }
 0x213   :  { %389 = vpow2.f32 %v357_v13 }
 0x219   :  { %v390_v14 = vpop.eup %389 }
 0x21a   :  { %v361_v15 = vadd.f32 1.0, %v390_v14  ;;  %v360_v25 = vsel %vm359_vm15, 1.0, %v390_v14 }
 0x21c   :  { %391 = vrcp.f32 %v361_v15  ;;  %v373_v19 = vand.u32 2147483648, %v361_v15  ;;  %v371_v21 = vand.u32 2147483647, %v361_v15  ;;  %vm367_vm13 = vweird.f32 %v361_v15 }
 0x21e   :  { %v374_v23 = vor.u32 1.1754944e-38, %v373_v19  ;;  %vm372_vm0 = vcmp.eq.f32.partialorder %v371_v21, 8.507059e+37 }
 0x222   :  { %v392_v16 = vpop.eup %391 }
 0x223   :  { %v363_v17 = vmul.f32 %v392_v16, %v361_v15  ;;  %vm368_vm12 = vweird.f32 %v392_v16 }
 0x224   :  { %vm369_vm14 = vmor %vm367_vm13, %vm368_vm12 }
 0x225   :  { %v364_v18 = vsub.f32 1.0, %v363_v17 }
 0x227   :  { %v365_v20 = vmul.f32 %v392_v16, %v364_v18 }
 0x229   :  { %v366_v22 = vadd.f32 %v392_v16, %v365_v20 }
 0x22b   :  { %v370_v24 = vsel %vm369_vm14, %v392_v16, %v366_v22 }
 0x22c   :  { %v375_v26 = vsel %vm372_vm0, %v374_v23, %v370_v24 }
 0x22d   :  { %v376_v27 = vmul.f32 %v375_v26, %v360_v25 }
 0x22f   :  { %378 = vst.msk [vmem:[%s672_s5] sm:$0x3] %vm377_vm1, %v376_v27 }

</bundles_post_ra>
